<compile_context>
chip_gen: v7x
topology: tpu7x:2x2x1
jax: 0.10.0
libtpu: 0.0.40
codegen_flags: <defaults>
</compile_context>

<pallas_src>
import jax
import jax.numpy as jnp
from jax.experimental import pallas as pl
from jax.experimental.pallas import tpu as pltpu


# ---- model dimensions (fixed by the PyTorch module) ------------------------------
C_IN = 6
C1, K1, PAD1 = 32, 5, 2
C2, K2, PAD2 = 64, 3, 1
C3, K3, PAD3 = 128, 3, 1
H = 128
G = 4 * H                      # 512 (i, f, g, o)
PATCH1 = 32                    # K1 * C_IN = 30 padded to 32 lanes


def _vmem_limit_bytes():
    """Generation-aware VMEM cap (v5e/v6e: 128 MiB phys, v7x: 64 MiB)."""
    try:
        cap = pltpu.get_tpu_info().vmem_capacity_bytes
    except Exception:
        cap = 64 * 1024 * 1024
    return int(min(cap * 3 // 4, 100 * 1024 * 1024))


def _pick_batch_tile(B, L, vmem_limit):
    """Batch-tile size: fold as many items as fit a VMEM budget (lane-padded est.)."""
    L1, L2 = L // 2, L // 4
    per_item = (
        L * 128 * 4                 # act1 scratch (f32, 32 lanes padded to 128)
        + (L1 + 2) * 128 * 4        # pad1 scratch
        + L1 * 128 * 2              # patch2 scratch (bf16, 96 -> 128 lanes)
        + L1 * 128 * 4              # act2 scratch
        + (L2 + 2) * 128 * 4        # pad2 scratch
        + L2 * 256 * 2              # patch3 scratch (bf16, 192 -> 256 lanes)
        + L2 * 128 * 2              # act3 scratch (bf16)
        + 2 * L * 128 * 2           # double-buffered im2col input block
        + 2 * L2 * G * 2            # double-buffered xp output block
    )
    budget = max(vmem_limit // 2, 1 << 20)
    Bb = max(1, min(B, 8, budget // max(per_item, 1)))
    while B % Bb:
        Bb -= 1
    return Bb


# ----------------------------------------------------------------------------------
# Fused CNN kernel: conv1+pool1+conv2+pool2+conv3 (+ReLU) + LSTM input projection
# ----------------------------------------------------------------------------------
def _make_cnn_kernel(Bb, L):
    L1, L2 = L // 2, L // 4
    T = L2

    def kernel(p1_ref, w1_ref, b1_ref, w2_ref, b2_ref, w3_ref, b3_ref,
               wih_ref, bih_ref, o_ref,
               act1_sc, pad1_sc, patch2_sc, act2_sc, pad2_sc, patch3_sc, act3_sc):
        f32 = jnp.float32

        # ---- conv1: single dense batch-folded matmul (M = Bb*L, K = 32) ----------
        a1 = jnp.dot(p1_ref[...], w1_ref[...], preferred_element_type=f32)
        act1_sc[...] = jnp.maximum(a1 + b1_ref[...], 0.0)

        # ---- pool1 (k=2, s=2) + per-item zero halo for conv2 ----------------------
        pad1_sc[...] = jnp.zeros(pad1_sc.shape, pad1_sc.dtype)
        for bb in range(Bb):
            s = bb * L
            d = bb * (L1 + 2)
            pad1_sc[pl.ds(d + 1, L1), :] = jnp.maximum(
                act1_sc[pl.ds(s, L1, stride=2), :],
                act1_sc[pl.ds(s + 1, L1, stride=2), :])

        # ---- conv2: tap-packed patches (contraction K2*C1 = 96), folded matmul ---
        for bb in range(Bb):
            d = bb * (L1 + 2)
            patch = jnp.concatenate(
                [pad1_sc[pl.ds(d + k, L1), :] for k in range(K2)], axis=-1)
            patch2_sc[pl.ds(bb * L1, L1), :] = patch.astype(patch2_sc.dtype)
        a2 = jnp.dot(patch2_sc[...], w2_ref[...], preferred_element_type=f32)
        act2_sc[...] = jnp.maximum(a2 + b2_ref[...], 0.0)

        # ---- pool2 + halo ---------------------------------------------------------
        pad2_sc[...] = jnp.zeros(pad2_sc.shape, pad2_sc.dtype)
        for bb in range(Bb):
            s = bb * L1
            d = bb * (L2 + 2)
            pad2_sc[pl.ds(d + 1, L2), :] = jnp.maximum(
                act2_sc[pl.ds(s, L2, stride=2), :],
                act2_sc[pl.ds(s + 1, L2, stride=2), :])

        # ---- conv3: tap-packed patches (contraction K3*C2 = 192), folded matmul --
        for bb in range(Bb):
            d = bb * (L2 + 2)
            patch = jnp.concatenate(
                [pad2_sc[pl.ds(d + k, L2), :] for k in range(K3)], axis=-1)
            patch3_sc[pl.ds(bb * L2, L2), :] = patch.astype(patch3_sc.dtype)
        a3 = jnp.dot(patch3_sc[...], w3_ref[...], preferred_element_type=f32)
        act3_sc[...] = jnp.maximum(a3 + b3_ref[...], 0.0).astype(act3_sc.dtype)

        # ---- fused LSTM input projection, written time-major bf16 -----------------
        for bb in range(Bb):
            feat = act3_sc[pl.ds(bb * T, T), :]                      # (T, 128) bf16
            xp = jnp.dot(feat, wih_ref[...],
                         preferred_element_type=f32) + bih_ref[...]  # (T, 512) f32
            o_ref[:, pl.ds(bb * G, G)] = xp.astype(o_ref.dtype)

    return kernel


def _cnn_lstm_inproj(p1, pk, B, L, Bb, vmem_limit):
    L1, L2 = L // 2, L // 4
    T = L2
    nb = B // Bb
    return pl.pallas_call(
        _make_cnn_kernel(Bb, L),
        out_shape=jax.ShapeDtypeStruct((T, B * G), jnp.bfloat16),
        grid=(nb,),
        in_specs=[
            pl.BlockSpec((Bb * L, PATCH1), lambda i: (i, 0)),   # im2col'd raw input
            pl.BlockSpec((PATCH1, C1), lambda i: (0, 0)),       # w1 packed (32, 32)
            pl.BlockSpec((1, C1), lambda i: (0, 0)),
            pl.BlockSpec((K2 * C1, C2), lambda i: (0, 0)),      # w2 packed (96, 64)
            pl.BlockSpec((1, C2), lambda i: (0, 0)),
            pl.BlockSpec((K3 * C2, C3), lambda i: (0, 0)),      # w3 packed (192, 128)
            pl.BlockSpec((1, C3), lambda i: (0, 0)),
            pl.BlockSpec((C3, G), lambda i: (0, 0)),            # W_ih^T (128, 512)
            pl.BlockSpec((1, G), lambda i: (0, 0)),             # b_ih + b_hh
        ],
        out_specs=pl.BlockSpec((T, Bb * G), lambda i: (0, i)),
        scratch_shapes=[
            pltpu.VMEM((Bb * L, C1), jnp.float32),              # act1
            pltpu.VMEM((Bb * (L1 + 2), C1), jnp.float32),       # pooled1 + halo
            pltpu.VMEM((Bb * L1, K2 * C1), jnp.bfloat16),       # conv2 patches
            pltpu.VMEM((Bb * L1, C2), jnp.float32),             # act2
            pltpu.VMEM((Bb * (L2 + 2), C2), jnp.float32),       # pooled2 + halo
            pltpu.VMEM((Bb * L2, K3 * C2), jnp.bfloat16),       # conv3 patches
            pltpu.VMEM((Bb * L2, C3), jnp.bfloat16),            # conv3 features
        ],
        compiler_params=pltpu.CompilerParams(
            dimension_semantics=("parallel",),
            vmem_limit_bytes=vmem_limit),
    )(p1, pk["w1"], pk["b1"], pk["w2"], pk["b2"], pk["w3"], pk["b3"],
      pk["w_ih"], pk["b_ihh"])


# ----------------------------------------------------------------------------------
# LSTM recurrence + fused FC(128->1)+sigmoid head, gridded over T-chunks
# ----------------------------------------------------------------------------------
def _lstm_kernel(xp_ref, whh_ref, wfc_ref, bfc_ref, y_ref, h_sc, c_sc):
    # xp_ref : (Tc, B, 4H) bf16    whh_ref: (H, 4H) bf16
    # wfc_ref: (1, H) f32          bfc_ref: (1, 1) f32
    # y_ref  : (B, Tc) f32         h_sc/c_sc: (B, H) f32 (persist across grid steps)
    Tc, B, Gg = xp_ref.shape
    Hh = Gg // 4

    @pl.when(pl.program_id(0) == 0)
    def _():
        h_sc[...] = jnp.zeros_like(h_sc)
        c_sc[...] = jnp.zeros_like(c_sc)

    whh = whh_ref[...]
    wfc = wfc_ref[...]
    bfc = bfc_ref[...]                                             # (1, 1)
    col = jax.lax.broadcasted_iota(jnp.int32, (B, Tc), 1)

    def step(t, carry):
        h, c, ylog = carry
        gates = xp_ref[t].astype(jnp.float32) + jnp.dot(
            h.astype(whh.dtype), whh, preferred_element_type=jnp.float32)
        ig = jax.nn.sigmoid(gates[:, 0 * Hh:1 * Hh])               # torch order i,f,g,o
        fg = jax.nn.sigmoid(gates[:, 1 * Hh:2 * Hh])
        gg = jnp.tanh(gates[:, 2 * Hh:3 * Hh])
        og = jax.nn.sigmoid(gates[:, 3 * Hh:4 * Hh])
        c = fg * c + ig * gg
        h = og * jnp.tanh(c)
        # FC head folded into the recurrence: lane reduction (XLU) per step.
        logit = jnp.sum(h * wfc, axis=-1, keepdims=True) + bfc     # (B, 1)
        ylog = jnp.where(col == t, logit, ylog)
        return h, c, ylog

    init = (h_sc[...], c_sc[...], jnp.zeros((B, Tc), jnp.float32))
    h, c, ylog = jax.lax.fori_loop(0, Tc, step, init, unroll=(Tc <= 16))
    h_sc[...] = h
    c_sc[...] = c
    y_ref[...] = jax.nn.sigmoid(ylog)                              # lane-dense (B, Tc)


def _lstm_fc(xp, pk, vmem_limit):
    T, B, Gg = xp.shape
    Tc = 128 if (T % 128 == 0) else T
    nt = T // Tc
    return pl.pallas_call(
        _lstm_kernel,
        out_shape=jax.ShapeDtypeStruct((B, T), jnp.float32),
        grid=(nt,),
        in_specs=[
            pl.BlockSpec((Tc, B, Gg), lambda t: (t, 0, 0)),        # xp T-chunks
            pl.BlockSpec((H, Gg), lambda t: (0, 0)),               # W_hh^T
            pl.BlockSpec((1, H), lambda t: (0, 0)),                # w_fc
            pl.BlockSpec((1, 1), lambda t: (0, 0)),                # b_fc
        ],
        out_specs=pl.BlockSpec((B, Tc), lambda t: (0, t)),
        scratch_shapes=[pltpu.VMEM((B, H), jnp.float32),
                        pltpu.VMEM((B, H), jnp.float32)],
        compiler_params=pltpu.CompilerParams(
            dimension_semantics=("arbitrary",),
            vmem_limit_bytes=vmem_limit),
    )(xp, pk["w_hh"], pk["w_fc"], pk["b_fc"])


# ----------------------------------------------------------------------------------
# Forward + parameter packing (packing is hoisted out of the forward path)
# ----------------------------------------------------------------------------------
def pack_params(p):
    def cw(w, rows_pad=None):
        cout, cin, k = w.shape
        wt = jnp.transpose(w, (2, 1, 0)).reshape(k * cin, cout)    # row = k*cin + ci
        if rows_pad is not None and rows_pad > k * cin:
            wt = jnp.pad(wt, ((0, rows_pad - k * cin), (0, 0)))
        return wt.astype(jnp.bfloat16)

    return dict(
        w1=cw(p["w1"], PATCH1),
        b1=p["b1"].reshape(1, C1).astype(jnp.float32),
        w2=cw(p["w2"]),
        b2=p["b2"].reshape(1, C2).astype(jnp.float32),
        w3=cw(p["w3"]),
        b3=p["b3"].reshape(1, C3).astype(jnp.float32),
        w_ih=jnp.transpose(p["w_ih"]).astype(jnp.bfloat16),        # (128, 512)
        b_ihh=(p["b_ih"] + p["b_hh"]).reshape(1, G).astype(jnp.float32),
        w_hh=jnp.transpose(p["w_hh"]).astype(jnp.bfloat16),        # (128, 512)
        w_fc=p["w_fc"].reshape(1, H).astype(jnp.float32),
        b_fc=p["b_fc"].reshape(1, 1).astype(jnp.float32),
    )


def cnn_lstm_forward(x, pk):
    # x: (B, 6, L) NCL, exactly like the PyTorch module.
    B, Cin, L = x.shape
    assert Cin == C_IN and L % 8 == 0
    T = L // 4

    # conv1 im2col on the tiny raw input (wrapper): (B, L, 30) -> 32 lanes, bf16.
    xt = jnp.transpose(x, (0, 2, 1))                               # (B, L, 6)
    xpad = jnp.pad(xt, ((0, 0), (PAD1, PAD1), (0, 0)))             # (B, L+4, 6)
    p1 = jnp.concatenate([xpad[:, k:k + L, :] for k in range(K1)], axis=-1)
    p1 = jnp.pad(p1, ((0, 0), (0, 0), (0, PATCH1 - K1 * C_IN)))
    p1 = p1.reshape(B * L, PATCH1).astype(jnp.bfloat16)

    vmem_limit = _vmem_limit_bytes()
    Bb = _pick_batch_tile(B, L, vmem_limit)
    xp2d = _cnn_lstm_inproj(p1, pk, B, L, Bb, vmem_limit)          # (T, B*4H) bf16
    xp = xp2d.reshape(T, B, G)                                     # free, row-major
    y = _lstm_fc(xp, pk, vmem_limit)                               # (B, T) f32
    return y[:, :, None]                                           # (B, T, 1)


# ----------------------------------------------------------------------------------
# Deterministic parameter init (shapes from the module's __init__)
# ----------------------------------------------------------------------------------
def init_params(key):
    ks = jax.random.split(key, 11)

    def u(k, shape, fan_in):
        bound = 1.0 / jnp.sqrt(jnp.float32(fan_in))
        return jax.random.uniform(k, shape, jnp.float32, -bound, bound)

    return dict(
        w1=u(ks[0], (32, 6, 5), 6 * 5),     b1=u(ks[1], (32,), 6 * 5),
        w2=u(ks[2], (64, 32, 3), 32 * 3),   b2=u(ks[3], (64,), 32 * 3),
        w3=u(ks[4], (128, 64, 3), 64 * 3),  b3=u(ks[5], (128,), 64 * 3),
        w_ih=u(ks[6], (4 * 128, 128), 128), w_hh=u(ks[7], (4 * 128, 128), 128),
        b_ih=u(ks[8], (4 * 128,), 128),     b_hh=u(ks[9], (4 * 128,), 128),
        w_fc=u(ks[10], (1, 128), 128),      b_fc=jnp.zeros((1,), jnp.float32),
    )


if __name__ == "__main__":
    key = jax.random.PRNGKey(0)
    pkey, xkey = jax.random.split(key)
    params = init_params(pkey)
    packed = pack_params(params)                 # packed once, outside the forward

    B, L = 2, 16                                 # seq after convs: T = L // 4 = 4
    x = jax.random.normal(xkey, (B, C_IN, L), jnp.float32)

    fwd = jax.jit(lambda inp: cnn_lstm_forward(inp, packed))
    y = fwd(x)
    jax.block_until_ready(y)
    assert y.shape == (B, L // 4, 1), y.shape
    assert bool(jnp.all(jnp.isfinite(y)))
    print("KERNEL_OK")
</pallas_src>

<mosaic_0001>
module attributes {stable_mosaic.version = 11 : i64} {
  func.func @kernel(%arg0: i32, %arg1: memref<32x32xbf16, #tpu.memory_space<vmem>>, %arg2: memref<32x32xbf16, #tpu.memory_space<vmem>>, %arg3: memref<1x32xf32, #tpu.memory_space<vmem>>, %arg4: memref<96x64xbf16, #tpu.memory_space<vmem>>, %arg5: memref<1x64xf32, #tpu.memory_space<vmem>>, %arg6: memref<192x128xbf16, #tpu.memory_space<vmem>>, %arg7: memref<1x128xf32, #tpu.memory_space<vmem>>, %arg8: memref<128x512xbf16, #tpu.memory_space<vmem>>, %arg9: memref<1x512xf32, #tpu.memory_space<vmem>>, %arg10: memref<4x1024xbf16, #tpu.memory_space<vmem>>, %arg11: memref<32x32xf32, #tpu.memory_space<vmem>>, %arg12: memref<20x32xf32, #tpu.memory_space<vmem>>, %arg13: memref<16x96xbf16, #tpu.memory_space<vmem>>, %arg14: memref<16x64xf32, #tpu.memory_space<vmem>>, %arg15: memref<12x64xf32, #tpu.memory_space<vmem>>, %arg16: memref<8x192xbf16, #tpu.memory_space<vmem>>, %arg17: memref<8x128xbf16, #tpu.memory_space<vmem>>) attributes {dimension_semantics = [#tpu.dimension_semantics<parallel>], iteration_bounds = array<i64: 1>, scalar_prefetch = 0 : i64, scratch_operands = 7 : i64, tpu.core_type = #tpu.core_type<tc>, window_params = [{transform_indices = @transform_0, window_bounds = array<i64: 32, 32>}, {pipeline_mode = #tpu.pipeline_mode<synchronous>, transform_indices = @transform_1, window_bounds = array<i64: 32, 32>}, {pipeline_mode = #tpu.pipeline_mode<synchronous>, transform_indices = @transform_2, window_bounds = array<i64: 1, 32>}, {pipeline_mode = #tpu.pipeline_mode<synchronous>, transform_indices = @transform_3, window_bounds = array<i64: 96, 64>}, {pipeline_mode = #tpu.pipeline_mode<synchronous>, transform_indices = @transform_4, window_bounds = array<i64: 1, 64>}, {pipeline_mode = #tpu.pipeline_mode<synchronous>, transform_indices = @transform_5, window_bounds = array<i64: 192, 128>}, {pipeline_mode = #tpu.pipeline_mode<synchronous>, transform_indices = @transform_6, window_bounds = array<i64: 1, 128>}, {pipeline_mode = #tpu.pipeline_mode<synchronous>, transform_indices = @transform_7, window_bounds = array<i64: 128, 512>}, {pipeline_mode = #tpu.pipeline_mode<synchronous>, transform_indices = @transform_8, window_bounds = array<i64: 1, 512>}, {transform_indices = @transform_9, window_bounds = array<i64: 4, 1024>}]} {
    %c0 = arith.constant 0 : index
    %c0_0 = arith.constant 0 : index
    %0 = vector.load %arg1[%c0, %c0_0] : memref<32x32xbf16, #tpu.memory_space<vmem>>, vector<32x32xbf16>
    %c0_1 = arith.constant 0 : index
    %c0_2 = arith.constant 0 : index
    %1 = vector.load %arg2[%c0_1, %c0_2] : memref<32x32xbf16, #tpu.memory_space<vmem>>, vector<32x32xbf16>
    %cst = arith.constant dense<0.000000e+00> : vector<32x32xf32>
    %2 = tpu.matmul %0, %1, %cst {dimension_numbers = #tpu.dot_dimension_numbers<[1], [0], [0], [1], [0, 0, 1, 1], [], []>} : vector<32x32xbf16>, vector<32x32xbf16>, vector<32x32xf32> -> vector<32x32xf32>
    %c0_3 = arith.constant 0 : index
    %c0_4 = arith.constant 0 : index
    %3 = vector.load %arg3[%c0_3, %c0_4] : memref<1x32xf32, #tpu.memory_space<vmem>>, vector<1x32xf32>
    %4 = vector.broadcast %3 : vector<1x32xf32> to vector<32x32xf32>
    %5 = arith.addf %2, %4 : vector<32x32xf32>
    %cst_5 = arith.constant 0.000000e+00 : f32
    %6 = vector.broadcast %cst_5 : f32 to vector<32x32xf32>
    %7 = arith.maximumf %5, %6 : vector<32x32xf32>
    %c0_6 = arith.constant 0 : index
    %c0_7 = arith.constant 0 : index
    %8 = vector.load %arg11[%c0_6, %c0_7] : memref<32x32xf32, #tpu.memory_space<vmem>>, vector<32x32xf32>
    tpu.vector_store %arg11[%c0_6, %c0_7], %7 {strides = array<i32>} : memref<32x32xf32, #tpu.memory_space<vmem>>, vector<32x32xf32>,
    %cst_8 = arith.constant 0.000000e+00 : f32
    %9 = vector.broadcast %cst_8 : f32 to vector<20x32xf32>
    %c0_9 = arith.constant 0 : index
    %c0_10 = arith.constant 0 : index
    %10 = vector.load %arg12[%c0_9, %c0_10] : memref<20x32xf32, #tpu.memory_space<vmem>>, vector<20x32xf32>
    tpu.vector_store %arg12[%c0_9, %c0_10], %9 {strides = array<i32>} : memref<20x32xf32, #tpu.memory_space<vmem>>, vector<20x32xf32>,
    %c0_11 = arith.constant 0 : index
    %c0_12 = arith.constant 0 : index
    %11 = tpu.strided_load %arg11[%c0_11, %c0_12] {strides = array<i32: 2, 1>} : memref<32x32xf32, #tpu.memory_space<vmem>>, vector<8x32xf32>
    %c1 = arith.constant 1 : index
    %c0_13 = arith.constant 0 : index
    %12 = tpu.strided_load %arg11[%c1, %c0_13] {strides = array<i32: 2, 1>} : memref<32x32xf32, #tpu.memory_space<vmem>>, vector<8x32xf32>
    %13 = arith.maximumf %11, %12 : vector<8x32xf32>
    %c1_14 = arith.constant 1 : index
    %c0_15 = arith.constant 0 : index
    %14 = vector.load %arg12[%c1_14, %c0_15] : memref<20x32xf32, #tpu.memory_space<vmem>>, vector<8x32xf32>
    tpu.vector_store %arg12[%c1_14, %c0_15], %13 {strides = array<i32>} : memref<20x32xf32, #tpu.memory_space<vmem>>, vector<8x32xf32>,
    %c16 = arith.constant 16 : index
    %c0_16 = arith.constant 0 : index
    %15 = tpu.strided_load %arg11[%c16, %c0_16] {strides = array<i32: 2, 1>} : memref<32x32xf32, #tpu.memory_space<vmem>>, vector<8x32xf32>
    %c17 = arith.constant 17 : index
    %c0_17 = arith.constant 0 : index
    %16 = tpu.strided_load %arg11[%c17, %c0_17] {strides = array<i32: 2, 1>} : memref<32x32xf32, #tpu.memory_space<vmem>>, vector<8x32xf32>
    %17 = arith.maximumf %15, %16 : vector<8x32xf32>
    %c11 = arith.constant 11 : index
    %c0_18 = arith.constant 0 : index
    %18 = vector.load %arg12[%c11, %c0_18] : memref<20x32xf32, #tpu.memory_space<vmem>>, vector<8x32xf32>
    tpu.vector_store %arg12[%c11, %c0_18], %17 {strides = array<i32>} : memref<20x32xf32, #tpu.memory_space<vmem>>, vector<8x32xf32>,
    %c0_19 = arith.constant 0 : index
    %c0_20 = arith.constant 0 : index
    %19 = vector.load %arg12[%c0_19, %c0_20] : memref<20x32xf32, #tpu.memory_space<vmem>>, vector<8x32xf32>
    %c1_21 = arith.constant 1 : index
    %c0_22 = arith.constant 0 : index
    %20 = vector.load %arg12[%c1_21, %c0_22] : memref<20x32xf32, #tpu.memory_space<vmem>>, vector<8x32xf32>
    %c2 = arith.constant 2 : index
    %c0_23 = arith.constant 0 : index
    %21 = vector.load %arg12[%c2, %c0_23] : memref<20x32xf32, #tpu.memory_space<vmem>>, vector<8x32xf32>
    %22 = tpu.concatenate %19, %20, %21 in 1 : vector<8x32xf32>, vector<8x32xf32>, vector<8x32xf32> -> vector<8x96xf32>
    %23 = arith.truncf %22 : vector<8x96xf32> to vector<8x96xbf16>
    %c0_24 = arith.constant 0 : index
    %c0_25 = arith.constant 0 : index
    %24 = vector.load %arg13[%c0_24, %c0_25] : memref<16x96xbf16, #tpu.memory_space<vmem>>, vector<8x96xbf16>
    tpu.vector_store %arg13[%c0_24, %c0_25], %23 {strides = array<i32>} : memref<16x96xbf16, #tpu.memory_space<vmem>>, vector<8x96xbf16>,
    %c10 = arith.constant 10 : index
    %c0_26 = arith.constant 0 : index
    %25 = vector.load %arg12[%c10, %c0_26] : memref<20x32xf32, #tpu.memory_space<vmem>>, vector<8x32xf32>
    %c11_27 = arith.constant 11 : index
    %c0_28 = arith.constant 0 : index
    %26 = vector.load %arg12[%c11_27, %c0_28] : memref<20x32xf32, #tpu.memory_space<vmem>>, vector<8x32xf32>
    %c12 = arith.constant 12 : index
    %c0_29 = arith.constant 0 : index
    %27 = vector.load %arg12[%c12, %c0_29] : memref<20x32xf32, #tpu.memory_space<vmem>>, vector<8x32xf32>
    %28 = tpu.concatenate %25, %26, %27 in 1 : vector<8x32xf32>, vector<8x32xf32>, vector<8x32xf32> -> vector<8x96xf32>
    %29 = arith.truncf %28 : vector<8x96xf32> to vector<8x96xbf16>
    %c8 = arith.constant 8 : index
    %c0_30 = arith.constant 0 : index
    %30 = vector.load %arg13[%c8, %c0_30] : memref<16x96xbf16, #tpu.memory_space<vmem>>, vector<8x96xbf16>
    tpu.vector_store %arg13[%c8, %c0_30], %29 {strides = array<i32>} : memref<16x96xbf16, #tpu.memory_space<vmem>>, vector<8x96xbf16>,
    %c0_31 = arith.constant 0 : index
    %c0_32 = arith.constant 0 : index
    %31 = vector.load %arg13[%c0_31, %c0_32] : memref<16x96xbf16, #tpu.memory_space<vmem>>, vector<16x96xbf16>
    %c0_33 = arith.constant 0 : index
    %c0_34 = arith.constant 0 : index
    %32 = vector.load %arg4[%c0_33, %c0_34] : memref<96x64xbf16, #tpu.memory_space<vmem>>, vector<96x64xbf16>
    %cst_35 = arith.constant dense<0.000000e+00> : vector<16x64xf32>
    %33 = tpu.matmul %31, %32, %cst_35 {dimension_numbers = #tpu.dot_dimension_numbers<[1], [0], [0], [1], [0, 0, 1, 1], [], []>} : vector<16x96xbf16>, vector<96x64xbf16>, vector<16x64xf32> -> vector<16x64xf32>
    %c0_36 = arith.constant 0 : index
    %c0_37 = arith.constant 0 : index
    %34 = vector.load %arg5[%c0_36, %c0_37] : memref<1x64xf32, #tpu.memory_space<vmem>>, vector<1x64xf32>
    %35 = vector.broadcast %34 : vector<1x64xf32> to vector<16x64xf32>
    %36 = arith.addf %33, %35 : vector<16x64xf32>
    %cst_38 = arith.constant 0.000000e+00 : f32
    %37 = vector.broadcast %cst_38 : f32 to vector<16x64xf32>
    %38 = arith.maximumf %36, %37 : vector<16x64xf32>
    %c0_39 = arith.constant 0 : index
    %c0_40 = arith.constant 0 : index
    %39 = vector.load %arg14[%c0_39, %c0_40] : memref<16x64xf32, #tpu.memory_space<vmem>>, vector<16x64xf32>
    tpu.vector_store %arg14[%c0_39, %c0_40], %38 {strides = array<i32>} : memref<16x64xf32, #tpu.memory_space<vmem>>, vector<16x64xf32>,
    %cst_41 = arith.constant 0.000000e+00 : f32
    %40 = vector.broadcast %cst_41 : f32 to vector<12x64xf32>
    %c0_42 = arith.constant 0 : index
    %c0_43 = arith.constant 0 : index
    %41 = vector.load %arg15[%c0_42, %c0_43] : memref<12x64xf32, #tpu.memory_space<vmem>>, vector<12x64xf32>
    tpu.vector_store %arg15[%c0_42, %c0_43], %40 {strides = array<i32>} : memref<12x64xf32, #tpu.memory_space<vmem>>, vector<12x64xf32>,
    %c0_44 = arith.constant 0 : index
    %c0_45 = arith.constant 0 : index
    %42 = tpu.strided_load %arg14[%c0_44, %c0_45] {strides = array<i32: 2, 1>} : memref<16x64xf32, #tpu.memory_space<vmem>>, vector<4x64xf32>
    %c1_46 = arith.constant 1 : index
    %c0_47 = arith.constant 0 : index
    %43 = tpu.strided_load %arg14[%c1_46, %c0_47] {strides = array<i32: 2, 1>} : memref<16x64xf32, #tpu.memory_space<vmem>>, vector<4x64xf32>
    %44 = arith.maximumf %42, %43 : vector<4x64xf32>
    %c1_48 = arith.constant 1 : index
    %c0_49 = arith.constant 0 : index
    %45 = vector.load %arg15[%c1_48, %c0_49] : memref<12x64xf32, #tpu.memory_space<vmem>>, vector<4x64xf32>
    tpu.vector_store %arg15[%c1_48, %c0_49], %44 {strides = array<i32>} : memref<12x64xf32, #tpu.memory_space<vmem>>, vector<4x64xf32>,
    %c8_50 = arith.constant 8 : index
    %c0_51 = arith.constant 0 : index
    %46 = tpu.strided_load %arg14[%c8_50, %c0_51] {strides = array<i32: 2, 1>} : memref<16x64xf32, #tpu.memory_space<vmem>>, vector<4x64xf32>
    %c9 = arith.constant 9 : index
    %c0_52 = arith.constant 0 : index
    %47 = tpu.strided_load %arg14[%c9, %c0_52] {strides = array<i32: 2, 1>} : memref<16x64xf32, #tpu.memory_space<vmem>>, vector<4x64xf32>
    %48 = arith.maximumf %46, %47 : vector<4x64xf32>
    %c7 = arith.constant 7 : index
    %c0_53 = arith.constant 0 : index
    %49 = vector.load %arg15[%c7, %c0_53] : memref<12x64xf32, #tpu.memory_space<vmem>>, vector<4x64xf32>
    tpu.vector_store %arg15[%c7, %c0_53], %48 {strides = array<i32>} : memref<12x64xf32, #tpu.memory_space<vmem>>, vector<4x64xf32>,
    %c0_54 = arith.constant 0 : index
    %c0_55 = arith.constant 0 : index
    %50 = vector.load %arg15[%c0_54, %c0_55] : memref<12x64xf32, #tpu.memory_space<vmem>>, vector<4x64xf32>
    %c1_56 = arith.constant 1 : index
    %c0_57 = arith.constant 0 : index
    %51 = vector.load %arg15[%c1_56, %c0_57] : memref<12x64xf32, #tpu.memory_space<vmem>>, vector<4x64xf32>
    %c2_58 = arith.constant 2 : index
    %c0_59 = arith.constant 0 : index
    %52 = vector.load %arg15[%c2_58, %c0_59] : memref<12x64xf32, #tpu.memory_space<vmem>>, vector<4x64xf32>
    %53 = tpu.concatenate %50, %51, %52 in 1 : vector<4x64xf32>, vector<4x64xf32>, vector<4x64xf32> -> vector<4x192xf32>
    %54 = arith.truncf %53 : vector<4x192xf32> to vector<4x192xbf16>
    %c0_60 = arith.constant 0 : index
    %c0_61 = arith.constant 0 : index
    %55 = vector.load %arg16[%c0_60, %c0_61] : memref<8x192xbf16, #tpu.memory_space<vmem>>, vector<4x192xbf16>
    tpu.vector_store %arg16[%c0_60, %c0_61], %54 {strides = array<i32>} : memref<8x192xbf16, #tpu.memory_space<vmem>>, vector<4x192xbf16>,
    %c6 = arith.constant 6 : index
    %c0_62 = arith.constant 0 : index
    %56 = vector.load %arg15[%c6, %c0_62] : memref<12x64xf32, #tpu.memory_space<vmem>>, vector<4x64xf32>
    %c7_63 = arith.constant 7 : index
    %c0_64 = arith.constant 0 : index
    %57 = vector.load %arg15[%c7_63, %c0_64] : memref<12x64xf32, #tpu.memory_space<vmem>>, vector<4x64xf32>
    %c8_65 = arith.constant 8 : index
    %c0_66 = arith.constant 0 : index
    %58 = vector.load %arg15[%c8_65, %c0_66] : memref<12x64xf32, #tpu.memory_space<vmem>>, vector<4x64xf32>
    %59 = tpu.concatenate %56, %57, %58 in 1 : vector<4x64xf32>, vector<4x64xf32>, vector<4x64xf32> -> vector<4x192xf32>
    %60 = arith.truncf %59 : vector<4x192xf32> to vector<4x192xbf16>
    %c4 = arith.constant 4 : index
    %c0_67 = arith.constant 0 : index
    %61 = vector.load %arg16[%c4, %c0_67] : memref<8x192xbf16, #tpu.memory_space<vmem>>, vector<4x192xbf16>
    tpu.vector_store %arg16[%c4, %c0_67], %60 {strides = array<i32>} : memref<8x192xbf16, #tpu.memory_space<vmem>>, vector<4x192xbf16>,
    %c0_68 = arith.constant 0 : index
    %c0_69 = arith.constant 0 : index
    %62 = vector.load %arg16[%c0_68, %c0_69] : memref<8x192xbf16, #tpu.memory_space<vmem>>, vector<8x192xbf16>
    %c0_70 = arith.constant 0 : index
    %c0_71 = arith.constant 0 : index
    %63 = vector.load %arg6[%c0_70, %c0_71] : memref<192x128xbf16, #tpu.memory_space<vmem>>, vector<192x128xbf16>
    %cst_72 = arith.constant dense<0.000000e+00> : vector<8x128xf32>
    %64 = tpu.matmul %62, %63, %cst_72 {dimension_numbers = #tpu.dot_dimension_numbers<[1], [0], [0], [1], [0, 0, 1, 1], [], []>} : vector<8x192xbf16>, vector<192x128xbf16>, vector<8x128xf32> -> vector<8x128xf32>
    %c0_73 = arith.constant 0 : index
    %c0_74 = arith.constant 0 : index
    %65 = vector.load %arg7[%c0_73, %c0_74] : memref<1x128xf32, #tpu.memory_space<vmem>>, vector<1x128xf32>
    %66 = vector.broadcast %65 : vector<1x128xf32> to vector<8x128xf32>
    %67 = arith.addf %64, %66 : vector<8x128xf32>
    %cst_75 = arith.constant 0.000000e+00 : f32
    %68 = vector.broadcast %cst_75 : f32 to vector<8x128xf32>
    %69 = arith.maximumf %67, %68 : vector<8x128xf32>
    %70 = arith.truncf %69 : vector<8x128xf32> to vector<8x128xbf16>
    %c0_76 = arith.constant 0 : index
    %c0_77 = arith.constant 0 : index
    %71 = vector.load %arg17[%c0_76, %c0_77] : memref<8x128xbf16, #tpu.memory_space<vmem>>, vector<8x128xbf16>
    tpu.vector_store %arg17[%c0_76, %c0_77], %70 {strides = array<i32>} : memref<8x128xbf16, #tpu.memory_space<vmem>>, vector<8x128xbf16>,
    %c0_78 = arith.constant 0 : index
    %c0_79 = arith.constant 0 : index
    %72 = vector.load %arg17[%c0_78, %c0_79] : memref<8x128xbf16, #tpu.memory_space<vmem>>, vector<4x128xbf16>
    %c0_80 = arith.constant 0 : index
    %c0_81 = arith.constant 0 : index
    %73 = vector.load %arg8[%c0_80, %c0_81] : memref<128x512xbf16, #tpu.memory_space<vmem>>, vector<128x512xbf16>
    %cst_82 = arith.constant dense<0.000000e+00> : vector<4x512xf32>
    %74 = tpu.matmul %72, %73, %cst_82 {dimension_numbers = #tpu.dot_dimension_numbers<[1], [0], [0], [1], [0, 0, 1, 1], [], []>} : vector<4x128xbf16>, vector<128x512xbf16>, vector<4x512xf32> -> vector<4x512xf32>
    %c0_83 = arith.constant 0 : index
    %c0_84 = arith.constant 0 : index
    %75 = vector.load %arg9[%c0_83, %c0_84] : memref<1x512xf32, #tpu.memory_space<vmem>>, vector<1x512xf32>
    %76 = vector.broadcast %75 : vector<1x512xf32> to vector<4x512xf32>
    %77 = arith.addf %74, %76 : vector<4x512xf32>
    %78 = arith.truncf %77 : vector<4x512xf32> to vector<4x512xbf16>
    %c0_85 = arith.constant 0 : index
    %c0_86 = arith.constant 0 : index
    %79 = vector.load %arg10[%c0_85, %c0_86] : memref<4x1024xbf16, #tpu.memory_space<vmem>>, vector<4x512xbf16>
    tpu.vector_store %arg10[%c0_85, %c0_86], %78 {strides = array<i32>} : memref<4x1024xbf16, #tpu.memory_space<vmem>>, vector<4x512xbf16>,
    %c4_87 = arith.constant 4 : index
    %c0_88 = arith.constant 0 : index
    %80 = vector.load %arg17[%c4_87, %c0_88] : memref<8x128xbf16, #tpu.memory_space<vmem>>, vector<4x128xbf16>
    %c0_89 = arith.constant 0 : index
    %c0_90 = arith.constant 0 : index
    %81 = vector.load %arg8[%c0_89, %c0_90] : memref<128x512xbf16, #tpu.memory_space<vmem>>, vector<128x512xbf16>
    %cst_91 = arith.constant dense<0.000000e+00> : vector<4x512xf32>
    %82 = tpu.matmul %80, %81, %cst_91 {dimension_numbers = #tpu.dot_dimension_numbers<[1], [0], [0], [1], [0, 0, 1, 1], [], []>} : vector<4x128xbf16>, vector<128x512xbf16>, vector<4x512xf32> -> vector<4x512xf32>
    %c0_92 = arith.constant 0 : index
    %c0_93 = arith.constant 0 : index
    %83 = vector.load %arg9[%c0_92, %c0_93] : memref<1x512xf32, #tpu.memory_space<vmem>>, vector<1x512xf32>
    %84 = vector.broadcast %83 : vector<1x512xf32> to vector<4x512xf32>
    %85 = arith.addf %82, %84 : vector<4x512xf32>
    %86 = arith.truncf %85 : vector<4x512xf32> to vector<4x512xbf16>
    %c0_94 = arith.constant 0 : index
    %c512 = arith.constant 512 : index
    %87 = vector.load %arg10[%c0_94, %c512] : memref<4x1024xbf16, #tpu.memory_space<vmem>>, vector<4x512xbf16>
    tpu.vector_store %arg10[%c0_94, %c512], %86 {strides = array<i32>} : memref<4x1024xbf16, #tpu.memory_space<vmem>>, vector<4x512xbf16>,
    return
  }
  func.func @transform_0(%arg0: i32) -> (i32, i32) {
    %c0_i32 = arith.constant 0 : i32
    %c0_i32_0 = arith.constant 0 : i32
    return %arg0, %c0_i32 : i32, i32
  }
  func.func @transform_1(%arg0: i32) -> (i32, i32) {
    %c0_i32 = arith.constant 0 : i32
    %c0_i32_0 = arith.constant 0 : i32
    %c0_i32_1 = arith.constant 0 : i32
    return %c0_i32, %c0_i32_0 : i32, i32
  }
  func.func @transform_2(%arg0: i32) -> (i32, i32) {
    %c0_i32 = arith.constant 0 : i32
    %c0_i32_0 = arith.constant 0 : i32
    %c0_i32_1 = arith.constant 0 : i32
    return %c0_i32, %c0_i32_0 : i32, i32
  }
  func.func @transform_3(%arg0: i32) -> (i32, i32) {
    %c0_i32 = arith.constant 0 : i32
    %c0_i32_0 = arith.constant 0 : i32
    %c0_i32_1 = arith.constant 0 : i32
    return %c0_i32, %c0_i32_0 : i32, i32
  }
  func.func @transform_4(%arg0: i32) -> (i32, i32) {
    %c0_i32 = arith.constant 0 : i32
    %c0_i32_0 = arith.constant 0 : i32
    %c0_i32_1 = arith.constant 0 : i32
    return %c0_i32, %c0_i32_0 : i32, i32
  }
  func.func @transform_5(%arg0: i32) -> (i32, i32) {
    %c0_i32 = arith.constant 0 : i32
    %c0_i32_0 = arith.constant 0 : i32
    %c0_i32_1 = arith.constant 0 : i32
    return %c0_i32, %c0_i32_0 : i32, i32
  }
  func.func @transform_6(%arg0: i32) -> (i32, i32) {
    %c0_i32 = arith.constant 0 : i32
    %c0_i32_0 = arith.constant 0 : i32
    %c0_i32_1 = arith.constant 0 : i32
    return %c0_i32, %c0_i32_0 : i32, i32
  }
  func.func @transform_7(%arg0: i32) -> (i32, i32) {
    %c0_i32 = arith.constant 0 : i32
    %c0_i32_0 = arith.constant 0 : i32
    %c0_i32_1 = arith.constant 0 : i32
    return %c0_i32, %c0_i32_0 : i32, i32
  }
  func.func @transform_8(%arg0: i32) -> (i32, i32) {
    %c0_i32 = arith.constant 0 : i32
    %c0_i32_0 = arith.constant 0 : i32
    %c0_i32_1 = arith.constant 0 : i32
    return %c0_i32, %c0_i32_0 : i32, i32
  }
  func.func @transform_9(%arg0: i32) -> (i32, i32) {
    %c0_i32 = arith.constant 0 : i32
    %c0_i32_0 = arith.constant 0 : i32
    return %c0_i32, %arg0 : i32, i32
  }
}

module attributes {stable_mosaic.version = 11 : i64} {
  func.func @_lstm_kernel(%arg0: i32, %arg1: memref<4x2x512xbf16, #tpu.memory_space<vmem>>, %arg2: memref<128x512xbf16, #tpu.memory_space<vmem>>, %arg3: memref<1x128xf32, #tpu.memory_space<vmem>>, %arg4: memref<1x1xf32, #tpu.memory_space<vmem>>, %arg5: memref<2x4xf32, #tpu.memory_space<vmem>>, %arg6: memref<2x128xf32, #tpu.memory_space<vmem>>, %arg7: memref<2x128xf32, #tpu.memory_space<vmem>>) attributes {dimension_semantics = [#tpu.dimension_semantics<arbitrary>], iteration_bounds = array<i64: 1>, scalar_prefetch = 0 : i64, scratch_operands = 2 : i64, tpu.core_type = #tpu.core_type<tc>, window_params = [{transform_indices = @transform_0, window_bounds = array<i64: 4, 2, 512>}, {pipeline_mode = #tpu.pipeline_mode<synchronous>, transform_indices = @transform_1, window_bounds = array<i64: 128, 512>}, {pipeline_mode = #tpu.pipeline_mode<synchronous>, transform_indices = @transform_2, window_bounds = array<i64: 1, 128>}, {pipeline_mode = #tpu.pipeline_mode<synchronous>, transform_indices = @transform_3, window_bounds = array<i64: 1, 1>}, {transform_indices = @transform_4, window_bounds = array<i64: 2, 4>}]} {
    %c0_i32 = arith.constant 0 : i32
    %0 = arith.cmpi eq, %arg0, %c0_i32 : i32
    %1 = arith.extui %0 : i1 to i32
    %c0_i32_0 = arith.constant 0 : i32
    %2 = arith.cmpi ne, %1, %c0_i32_0 : i32
    scf.if %2 {
      %cst_46 = arith.constant 0.000000e+00 : f32
      %190 = vector.broadcast %cst_46 : f32 to vector<2x128xf32>
      %c0_47 = arith.constant 0 : index
      %c0_48 = arith.constant 0 : index
      %191 = vector.load %arg6[%c0_47, %c0_48] : memref<2x128xf32, #tpu.memory_space<vmem>>, vector<2x128xf32>
      tpu.vector_store %arg6[%c0_47, %c0_48], %190 {strides = array<i32>} : memref<2x128xf32, #tpu.memory_space<vmem>>, vector<2x128xf32>,
      %cst_49 = arith.constant 0.000000e+00 : f32
      %192 = vector.broadcast %cst_49 : f32 to vector<2x128xf32>
      %c0_50 = arith.constant 0 : index
      %c0_51 = arith.constant 0 : index
      %193 = vector.load %arg7[%c0_50, %c0_51] : memref<2x128xf32, #tpu.memory_space<vmem>>, vector<2x128xf32>
      tpu.vector_store %arg7[%c0_50, %c0_51], %192 {strides = array<i32>} : memref<2x128xf32, #tpu.memory_space<vmem>>, vector<2x128xf32>,
    } else {
    }
    %c0 = arith.constant 0 : index
    %c0_1 = arith.constant 0 : index
    %3 = vector.load %arg2[%c0, %c0_1] : memref<128x512xbf16, #tpu.memory_space<vmem>>, vector<128x512xbf16>
    %c0_2 = arith.constant 0 : index
    %c0_3 = arith.constant 0 : index
    %4 = vector.load %arg3[%c0_2, %c0_3] : memref<1x128xf32, #tpu.memory_space<vmem>>, vector<1x128xf32>
    %c0_4 = arith.constant 0 : index
    %c0_5 = arith.constant 0 : index
    %5 = vector.load %arg4[%c0_4, %c0_5] : memref<1x1xf32, #tpu.memory_space<vmem>>, vector<1x1xf32>
    %6 = tpu.iota {dimensions = array<i32: 1>} : vector<2x4xi32>
    %c0_6 = arith.constant 0 : index
    %c0_7 = arith.constant 0 : index
    %7 = vector.load %arg6[%c0_6, %c0_7] : memref<2x128xf32, #tpu.memory_space<vmem>>, vector<2x128xf32>
    %c0_8 = arith.constant 0 : index
    %c0_9 = arith.constant 0 : index
    %8 = vector.load %arg7[%c0_8, %c0_9] : memref<2x128xf32, #tpu.memory_space<vmem>>, vector<2x128xf32>
    %cst = arith.constant 0.000000e+00 : f32
    %9 = vector.broadcast %cst : f32 to vector<2x4xf32>
    %c0_i32_10 = arith.constant 0 : i32
    %10 = arith.index_cast %c0_i32_10 : i32 to index
    %c0_11 = arith.constant 0 : index
    %c0_12 = arith.constant 0 : index
    %11 = vector.load %arg1[%10, %c0_11, %c0_12] : memref<4x2x512xbf16, #tpu.memory_space<vmem>>, vector<1x2x512xbf16>
    %12 = vector.shape_cast %11 : vector<1x2x512xbf16> to vector<2x512xbf16>
    %13 = arith.extf %12 : vector<2x512xbf16> to vector<2x512xf32>
    %14 = arith.truncf %7 : vector<2x128xf32> to vector<2x128xbf16>
    %cst_13 = arith.constant dense<0.000000e+00> : vector<2x512xf32>
    %15 = tpu.matmul %14, %3, %cst_13 {dimension_numbers = #tpu.dot_dimension_numbers<[1], [0], [0], [1], [0, 0, 1, 1], [], []>} : vector<2x128xbf16>, vector<128x512xbf16>, vector<2x512xf32> -> vector<2x512xf32>
    %16 = arith.addf %13, %15 : vector<2x512xf32>
    %17 = vector.extract_strided_slice %16 {offsets = [0, 0], sizes = [2, 128], strides = [1, 1]} : vector<2x512xf32> to vector<2x128xf32>
    %18 = arith.negf %17 : vector<2x128xf32>
    %19 = math.exp %18 : vector<2x128xf32>
    %cst_14 = arith.constant 1.000000e+00 : f32
    %20 = vector.broadcast %cst_14 : f32 to vector<2x128xf32>
    %21 = arith.addf %20, %19 : vector<2x128xf32>
    %22 = arith.divf %20, %21 : vector<2x128xf32>
    %23 = vector.extract_strided_slice %16 {offsets = [0, 128], sizes = [2, 128], strides = [1, 1]} : vector<2x512xf32> to vector<2x128xf32>
    %24 = arith.negf %23 : vector<2x128xf32>
    %25 = math.exp %24 : vector<2x128xf32>
    %cst_15 = arith.constant 1.000000e+00 : f32
    %26 = vector.broadcast %cst_15 : f32 to vector<2x128xf32>
    %27 = arith.addf %26, %25 : vector<2x128xf32>
    %28 = arith.divf %26, %27 : vector<2x128xf32>
    %29 = vector.extract_strided_slice %16 {offsets = [0, 256], sizes = [2, 128], strides = [1, 1]} : vector<2x512xf32> to vector<2x128xf32>
    %30 = math.tanh %29 : vector<2x128xf32>
    %31 = vector.extract_strided_slice %16 {offsets = [0, 384], sizes = [2, 128], strides = [1, 1]} : vector<2x512xf32> to vector<2x128xf32>
    %32 = arith.negf %31 : vector<2x128xf32>
    %33 = math.exp %32 : vector<2x128xf32>
    %cst_16 = arith.constant 1.000000e+00 : f32
    %34 = vector.broadcast %cst_16 : f32 to vector<2x128xf32>
    %35 = arith.addf %34, %33 : vector<2x128xf32>
    %36 = arith.divf %34, %35 : vector<2x128xf32>
    %37 = arith.mulf %28, %8 : vector<2x128xf32>
    %38 = arith.mulf %22, %30 : vector<2x128xf32>
    %39 = arith.addf %37, %38 : vector<2x128xf32>
    %40 = math.tanh %39 : vector<2x128xf32>
    %41 = arith.mulf %36, %40 : vector<2x128xf32>
    %42 = vector.broadcast %4 : vector<1x128xf32> to vector<2x128xf32>
    %43 = arith.mulf %41, %42 : vector<2x128xf32>
    %cst_17 = arith.constant dense<0.000000e+00> : vector<2xf32>
    %44 = vector.multi_reduction <add>, %43, %cst_17 [1] : vector<2x128xf32> to vector<2xf32>
    %45 = vector.shape_cast %44 : vector<2xf32> to vector<2x1xf32>
    %46 = vector.broadcast %5 : vector<1x1xf32> to vector<2x1xf32>
    %47 = arith.addf %45, %46 : vector<2x1xf32>
    %48 = vector.broadcast %c0_i32_10 : i32 to vector<2x4xi32>
    %49 = arith.cmpi eq, %6, %48 : vector<2x4xi32>
    %50 = vector.shape_cast %47 : vector<2x1xf32> to vector<2x1xf32>
    %51 = vector.broadcast %50 : vector<2x1xf32> to vector<2x4xf32>
    %52 = arith.select %49, %51, %9 : vector<2x4xi1>, vector<2x4xf32>
    %c1_i32 = arith.constant 1 : i32
    %53 = arith.index_cast %c1_i32 : i32 to index
    %c0_18 = arith.constant 0 : index
    %c0_19 = arith.constant 0 : index
    %54 = vector.load %arg1[%53, %c0_18, %c0_19] : memref<4x2x512xbf16, #tpu.memory_space<vmem>>, vector<1x2x512xbf16>
    %55 = vector.shape_cast %54 : vector<1x2x512xbf16> to vector<2x512xbf16>
    %56 = arith.extf %55 : vector<2x512xbf16> to vector<2x512xf32>
    %57 = arith.truncf %41 : vector<2x128xf32> to vector<2x128xbf16>
    %cst_20 = arith.constant dense<0.000000e+00> : vector<2x512xf32>
    %58 = tpu.matmul %57, %3, %cst_20 {dimension_numbers = #tpu.dot_dimension_numbers<[1], [0], [0], [1], [0, 0, 1, 1], [], []>} : vector<2x128xbf16>, vector<128x512xbf16>, vector<2x512xf32> -> vector<2x512xf32>
    %59 = arith.addf %56, %58 : vector<2x512xf32>
    %60 = vector.extract_strided_slice %59 {offsets = [0, 0], sizes = [2, 128], strides = [1, 1]} : vector<2x512xf32> to vector<2x128xf32>
    %61 = arith.negf %60 : vector<2x128xf32>
    %62 = math.exp %61 : vector<2x128xf32>
    %cst_21 = arith.constant 1.000000e+00 : f32
    %63 = vector.broadcast %cst_21 : f32 to vector<2x128xf32>
    %64 = arith.addf %63, %62 : vector<2x128xf32>
    %65 = arith.divf %63, %64 : vector<2x128xf32>
    %66 = vector.extract_strided_slice %59 {offsets = [0, 128], sizes = [2, 128], strides = [1, 1]} : vector<2x512xf32> to vector<2x128xf32>
    %67 = arith.negf %66 : vector<2x128xf32>
    %68 = math.exp %67 : vector<2x128xf32>
    %cst_22 = arith.constant 1.000000e+00 : f32
    %69 = vector.broadcast %cst_22 : f32 to vector<2x128xf32>
    %70 = arith.addf %69, %68 : vector<2x128xf32>
    %71 = arith.divf %69, %70 : vector<2x128xf32>
    %72 = vector.extract_strided_slice %59 {offsets = [0, 256], sizes = [2, 128], strides = [1, 1]} : vector<2x512xf32> to vector<2x128xf32>
    %73 = math.tanh %72 : vector<2x128xf32>
    %74 = vector.extract_strided_slice %59 {offsets = [0, 384], sizes = [2, 128], strides = [1, 1]} : vector<2x512xf32> to vector<2x128xf32>
    %75 = arith.negf %74 : vector<2x128xf32>
    %76 = math.exp %75 : vector<2x128xf32>
    %cst_23 = arith.constant 1.000000e+00 : f32
    %77 = vector.broadcast %cst_23 : f32 to vector<2x128xf32>
    %78 = arith.addf %77, %76 : vector<2x128xf32>
    %79 = arith.divf %77, %78 : vector<2x128xf32>
    %80 = arith.mulf %71, %39 : vector<2x128xf32>
    %81 = arith.mulf %65, %73 : vector<2x128xf32>
    %82 = arith.addf %80, %81 : vector<2x128xf32>
    %83 = math.tanh %82 : vector<2x128xf32>
    %84 = arith.mulf %79, %83 : vector<2x128xf32>
    %85 = vector.broadcast %4 : vector<1x128xf32> to vector<2x128xf32>
    %86 = arith.mulf %84, %85 : vector<2x128xf32>
    %cst_24 = arith.constant dense<0.000000e+00> : vector<2xf32>
    %87 = vector.multi_reduction <add>, %86, %cst_24 [1] : vector<2x128xf32> to vector<2xf32>
    %88 = vector.shape_cast %87 : vector<2xf32> to vector<2x1xf32>
    %89 = vector.broadcast %5 : vector<1x1xf32> to vector<2x1xf32>
    %90 = arith.addf %88, %89 : vector<2x1xf32>
    %91 = vector.broadcast %c1_i32 : i32 to vector<2x4xi32>
    %92 = arith.cmpi eq, %6, %91 : vector<2x4xi32>
    %93 = vector.shape_cast %90 : vector<2x1xf32> to vector<2x1xf32>
    %94 = vector.broadcast %93 : vector<2x1xf32> to vector<2x4xf32>
    %95 = arith.select %92, %94, %52 : vector<2x4xi1>, vector<2x4xf32>
    %c2_i32 = arith.constant 2 : i32
    %96 = arith.index_cast %c2_i32 : i32 to index
    %c0_25 = arith.constant 0 : index
    %c0_26 = arith.constant 0 : index
    %97 = vector.load %arg1[%96, %c0_25, %c0_26] : memref<4x2x512xbf16, #tpu.memory_space<vmem>>, vector<1x2x512xbf16>
    %98 = vector.shape_cast %97 : vector<1x2x512xbf16> to vector<2x512xbf16>
    %99 = arith.extf %98 : vector<2x512xbf16> to vector<2x512xf32>
    %100 = arith.truncf %84 : vector<2x128xf32> to vector<2x128xbf16>
    %cst_27 = arith.constant dense<0.000000e+00> : vector<2x512xf32>
    %101 = tpu.matmul %100, %3, %cst_27 {dimension_numbers = #tpu.dot_dimension_numbers<[1], [0], [0], [1], [0, 0, 1, 1], [], []>} : vector<2x128xbf16>, vector<128x512xbf16>, vector<2x512xf32> -> vector<2x512xf32>
    %102 = arith.addf %99, %101 : vector<2x512xf32>
    %103 = vector.extract_strided_slice %102 {offsets = [0, 0], sizes = [2, 128], strides = [1, 1]} : vector<2x512xf32> to vector<2x128xf32>
    %104 = arith.negf %103 : vector<2x128xf32>
    %105 = math.exp %104 : vector<2x128xf32>
    %cst_28 = arith.constant 1.000000e+00 : f32
    %106 = vector.broadcast %cst_28 : f32 to vector<2x128xf32>
    %107 = arith.addf %106, %105 : vector<2x128xf32>
    %108 = arith.divf %106, %107 : vector<2x128xf32>
    %109 = vector.extract_strided_slice %102 {offsets = [0, 128], sizes = [2, 128], strides = [1, 1]} : vector<2x512xf32> to vector<2x128xf32>
    %110 = arith.negf %109 : vector<2x128xf32>
    %111 = math.exp %110 : vector<2x128xf32>
    %cst_29 = arith.constant 1.000000e+00 : f32
    %112 = vector.broadcast %cst_29 : f32 to vector<2x128xf32>
    %113 = arith.addf %112, %111 : vector<2x128xf32>
    %114 = arith.divf %112, %113 : vector<2x128xf32>
    %115 = vector.extract_strided_slice %102 {offsets = [0, 256], sizes = [2, 128], strides = [1, 1]} : vector<2x512xf32> to vector<2x128xf32>
    %116 = math.tanh %115 : vector<2x128xf32>
    %117 = vector.extract_strided_slice %102 {offsets = [0, 384], sizes = [2, 128], strides = [1, 1]} : vector<2x512xf32> to vector<2x128xf32>
    %118 = arith.negf %117 : vector<2x128xf32>
    %119 = math.exp %118 : vector<2x128xf32>
    %cst_30 = arith.constant 1.000000e+00 : f32
    %120 = vector.broadcast %cst_30 : f32 to vector<2x128xf32>
    %121 = arith.addf %120, %119 : vector<2x128xf32>
    %122 = arith.divf %120, %121 : vector<2x128xf32>
    %123 = arith.mulf %114, %82 : vector<2x128xf32>
    %124 = arith.mulf %108, %116 : vector<2x128xf32>
    %125 = arith.addf %123, %124 : vector<2x128xf32>
    %126 = math.tanh %125 : vector<2x128xf32>
    %127 = arith.mulf %122, %126 : vector<2x128xf32>
    %128 = vector.broadcast %4 : vector<1x128xf32> to vector<2x128xf32>
    %129 = arith.mulf %127, %128 : vector<2x128xf32>
    %cst_31 = arith.constant dense<0.000000e+00> : vector<2xf32>
    %130 = vector.multi_reduction <add>, %129, %cst_31 [1] : vector<2x128xf32> to vector<2xf32>
    %131 = vector.shape_cast %130 : vector<2xf32> to vector<2x1xf32>
    %132 = vector.broadcast %5 : vector<1x1xf32> to vector<2x1xf32>
    %133 = arith.addf %131, %132 : vector<2x1xf32>
    %134 = vector.broadcast %c2_i32 : i32 to vector<2x4xi32>
    %135 = arith.cmpi eq, %6, %134 : vector<2x4xi32>
    %136 = vector.shape_cast %133 : vector<2x1xf32> to vector<2x1xf32>
    %137 = vector.broadcast %136 : vector<2x1xf32> to vector<2x4xf32>
    %138 = arith.select %135, %137, %95 : vector<2x4xi1>, vector<2x4xf32>
    %c3_i32 = arith.constant 3 : i32
    %139 = arith.index_cast %c3_i32 : i32 to index
    %c0_32 = arith.constant 0 : index
    %c0_33 = arith.constant 0 : index
    %140 = vector.load %arg1[%139, %c0_32, %c0_33] : memref<4x2x512xbf16, #tpu.memory_space<vmem>>, vector<1x2x512xbf16>
    %141 = vector.shape_cast %140 : vector<1x2x512xbf16> to vector<2x512xbf16>
    %142 = arith.extf %141 : vector<2x512xbf16> to vector<2x512xf32>
    %143 = arith.truncf %127 : vector<2x128xf32> to vector<2x128xbf16>
    %cst_34 = arith.constant dense<0.000000e+00> : vector<2x512xf32>
    %144 = tpu.matmul %143, %3, %cst_34 {dimension_numbers = #tpu.dot_dimension_numbers<[1], [0], [0], [1], [0, 0, 1, 1], [], []>} : vector<2x128xbf16>, vector<128x512xbf16>, vector<2x512xf32> -> vector<2x512xf32>
    %145 = arith.addf %142, %144 : vector<2x512xf32>
    %146 = vector.extract_strided_slice %145 {offsets = [0, 0], sizes = [2, 128], strides = [1, 1]} : vector<2x512xf32> to vector<2x128xf32>
    %147 = arith.negf %146 : vector<2x128xf32>
    %148 = math.exp %147 : vector<2x128xf32>
    %cst_35 = arith.constant 1.000000e+00 : f32
    %149 = vector.broadcast %cst_35 : f32 to vector<2x128xf32>
    %150 = arith.addf %149, %148 : vector<2x128xf32>
    %151 = arith.divf %149, %150 : vector<2x128xf32>
    %152 = vector.extract_strided_slice %145 {offsets = [0, 128], sizes = [2, 128], strides = [1, 1]} : vector<2x512xf32> to vector<2x128xf32>
    %153 = arith.negf %152 : vector<2x128xf32>
    %154 = math.exp %153 : vector<2x128xf32>
    %cst_36 = arith.constant 1.000000e+00 : f32
    %155 = vector.broadcast %cst_36 : f32 to vector<2x128xf32>
    %156 = arith.addf %155, %154 : vector<2x128xf32>
    %157 = arith.divf %155, %156 : vector<2x128xf32>
    %158 = vector.extract_strided_slice %145 {offsets = [0, 256], sizes = [2, 128], strides = [1, 1]} : vector<2x512xf32> to vector<2x128xf32>
    %159 = math.tanh %158 : vector<2x128xf32>
    %160 = vector.extract_strided_slice %145 {offsets = [0, 384], sizes = [2, 128], strides = [1, 1]} : vector<2x512xf32> to vector<2x128xf32>
    %161 = arith.negf %160 : vector<2x128xf32>
    %162 = math.exp %161 : vector<2x128xf32>
    %cst_37 = arith.constant 1.000000e+00 : f32
    %163 = vector.broadcast %cst_37 : f32 to vector<2x128xf32>
    %164 = arith.addf %163, %162 : vector<2x128xf32>
    %165 = arith.divf %163, %164 : vector<2x128xf32>
    %166 = arith.mulf %157, %125 : vector<2x128xf32>
    %167 = arith.mulf %151, %159 : vector<2x128xf32>
    %168 = arith.addf %166, %167 : vector<2x128xf32>
    %169 = math.tanh %168 : vector<2x128xf32>
    %170 = arith.mulf %165, %169 : vector<2x128xf32>
    %171 = vector.broadcast %4 : vector<1x128xf32> to vector<2x128xf32>
    %172 = arith.mulf %170, %171 : vector<2x128xf32>
    %cst_38 = arith.constant dense<0.000000e+00> : vector<2xf32>
    %173 = vector.multi_reduction <add>, %172, %cst_38 [1] : vector<2x128xf32> to vector<2xf32>
    %174 = vector.shape_cast %173 : vector<2xf32> to vector<2x1xf32>
    %175 = vector.broadcast %5 : vector<1x1xf32> to vector<2x1xf32>
    %176 = arith.addf %174, %175 : vector<2x1xf32>
    %177 = vector.broadcast %c3_i32 : i32 to vector<2x4xi32>
    %178 = arith.cmpi eq, %6, %177 : vector<2x4xi32>
    %179 = vector.shape_cast %176 : vector<2x1xf32> to vector<2x1xf32>
    %180 = vector.broadcast %179 : vector<2x1xf32> to vector<2x4xf32>
    %181 = arith.select %178, %180, %138 : vector<2x4xi1>, vector<2x4xf32>
    %c4_i32 = arith.constant 4 : i32
    %c0_39 = arith.constant 0 : index
    %c0_40 = arith.constant 0 : index
    %182 = vector.load %arg6[%c0_39, %c0_40] : memref<2x128xf32, #tpu.memory_space<vmem>>, vector<2x128xf32>
    tpu.vector_store %arg6[%c0_39, %c0_40], %170 {strides = array<i32>} : memref<2x128xf32, #tpu.memory_space<vmem>>, vector<2x128xf32>,
    %c0_41 = arith.constant 0 : index
    %c0_42 = arith.constant 0 : index
    %183 = vector.load %arg7[%c0_41, %c0_42] : memref<2x128xf32, #tpu.memory_space<vmem>>, vector<2x128xf32>
    tpu.vector_store %arg7[%c0_41, %c0_42], %168 {strides = array<i32>} : memref<2x128xf32, #tpu.memory_space<vmem>>, vector<2x128xf32>,
    %184 = arith.negf %181 : vector<2x4xf32>
    %185 = math.exp %184 : vector<2x4xf32>
    %cst_43 = arith.constant 1.000000e+00 : f32
    %186 = vector.broadcast %cst_43 : f32 to vector<2x4xf32>
    %187 = arith.addf %186, %185 : vector<2x4xf32>
    %188 = arith.divf %186, %187 : vector<2x4xf32>
    %c0_44 = arith.constant 0 : index
    %c0_45 = arith.constant 0 : index
    %189 = vector.load %arg5[%c0_44, %c0_45] : memref<2x4xf32, #tpu.memory_space<vmem>>, vector<2x4xf32>
    tpu.vector_store %arg5[%c0_44, %c0_45], %188 {strides = array<i32>} : memref<2x4xf32, #tpu.memory_space<vmem>>, vector<2x4xf32>,
    return
  }
  func.func @transform_0(%arg0: i32) -> (i32, i32, i32) {
    %c0_i32 = arith.constant 0 : i32
    %c0_i32_0 = arith.constant 0 : i32
    %c0_i32_1 = arith.constant 0 : i32
    return %arg0, %c0_i32, %c0_i32_0 : i32, i32, i32
  }
  func.func @transform_1(%arg0: i32) -> (i32, i32) {
    %c0_i32 = arith.constant 0 : i32
    %c0_i32_0 = arith.constant 0 : i32
    %c0_i32_1 = arith.constant 0 : i32
    return %c0_i32, %c0_i32_0 : i32, i32
  }
  func.func @transform_2(%arg0: i32) -> (i32, i32) {
    %c0_i32 = arith.constant 0 : i32
    %c0_i32_0 = arith.constant 0 : i32
    %c0_i32_1 = arith.constant 0 : i32
    return %c0_i32, %c0_i32_0 : i32, i32
  }
  func.func @transform_3(%arg0: i32) -> (i32, i32) {
    %c0_i32 = arith.constant 0 : i32
    %c0_i32_0 = arith.constant 0 : i32
    %c0_i32_1 = arith.constant 0 : i32
    return %c0_i32, %c0_i32_0 : i32, i32
  }
  func.func @transform_4(%arg0: i32) -> (i32, i32) {
    %c0_i32 = arith.constant 0 : i32
    %c0_i32_0 = arith.constant 0 : i32
    return %c0_i32, %arg0 : i32, i32
  }
}

</mosaic_0001>

<bundles_post_ra>
// kernel: _lambda_.3
= control target key start
LH: loop header
LB: loop body
LE: loop exit
PB: predicated region body
PF: predicated region fallthrough
CT: control target
= control target key end

     0   :  { %s1460_s0 = inlined_call_operand.vmem [shape: bf16[4,2,512], index: 0, kind: input, shape index: {}]   ;;  %s1461_s1 = inlined_call_operand.vmem [shape: bf16[128,512], index: 1, kind: input, shape index: {}]   ;;  %s1462_s2 = inlined_call_operand.vmem [shape: f32[1,128], index: 2, kind: input, shape index: {}]   ;;  %s1463_s3 = inlined_call_operand.<no memory space> [shape: f32[1,1], index: 3, kind: input, shape index: {}]   ;;  %s1464_s4 = inlined_call_operand.hbm [shape: f32[2,4], index: 4, kind: output, shape index: {}]  }
   0x1   :  { %v9_v0 = vstv %s1463_s3 }
   0x2   :  { %10 = vst [vmem:[#allocation4] sm:$0x1] %v9_v0 }
   0x3   :  { %v1100_v1 = vld [vmem:[%s1461_s1 + $0x4] ss:$16 sps:$4 sm:$0xff]   ;;  %v1105_v2 = vld [vmem:[%s1461_s1 + $0xc] ss:$16 sps:$4 sm:$0xff]   ;;  %v1065_v3 = vmov 0   ;;  %v1066_v4 = vmov 0.0  }
   0x4   :  { %260 = vmatprep.mubr.bf16.mxu0 %v1065_v3  ;;  %301 = vmatprep.mubr.bf16.mxu1 %v1065_v3  ;;  %25 = vst [vmem:[#allocation2] sm:$0x3] %v1066_v4  ;;  %26 = vst [vmem:[#allocation3] sm:$0x3] %v1066_v4  ;;  %v1113_v5 = vld [vmem:[%s1461_s1] ss:$16 sps:$4 sm:$0xff]  }
   0x5   :  { %228 = vmatprep.subr.bf16.mxu0 %v1100_v1  ;;  %v1118_v6 = vld [vmem:[%s1461_s1 + $0x8] ss:$16 sps:$4 sm:$0xff]   ;;  %923 = vset.pattern.permute.xlu0 %v1065_v3  ;;  %v1125_v7 = vld [vmem:[%s1461_s1 + $0x24] ss:$16 sps:$4 sm:$0xff]   ;;  %v1133_v8 = vld [vmem:[%s1461_s1 + $0x2c] ss:$16 sps:$4 sm:$0xff]  }
   0x6   :  { %269 = vmatprep.subr.bf16.mxu1 %v1105_v2  ;;  %924 = vset.pattern.permute.xlu1 %v1065_v3  ;;  %v1138_v9 = vld [vmem:[%s1461_s1 + $0x20] ss:$16 sps:$4 sm:$0xff]   ;;  %v1144_v10 = vld [vmem:[%s1461_s1 + $0x28] ss:$16 sps:$4 sm:$0xff]   ;;  %v1150_v11 = vld [vmem:[%s1461_s1 + $0x44] ss:$16 sps:$4 sm:$0xff]  }
   0x7   :  { %229 = vmatpush1.bf16.msra.mxu0 %v1113_v5  ;;  %270 = vmatpush1.bf16.msra.mxu1 %v1118_v6  ;;  %v1155_v12 = vld [vmem:[%s1461_s1 + $0x4c] ss:$16 sps:$4 sm:$0xff]   ;;  %v1160_v13 = vld [vmem:[%s1461_s1 + $0x40] ss:$16 sps:$4 sm:$0xff]   ;;  %v1165_v14 = vld [vmem:[%s1461_s1 + $0x48] ss:$16 sps:$4 sm:$0xff]  }
   0x8   :  { %230 = vmatprep.subr.bf16.mxu0 %v1125_v7  ;;  %271 = vmatprep.subr.bf16.mxu1 %v1133_v8  ;;  %v1172_v15 = vld [vmem:[%s1461_s1 + $0x64] ss:$16 sps:$4 sm:$0xff]   ;;  %v1179_v16 = vld [vmem:[%s1461_s1 + $0x6c] ss:$16 sps:$4 sm:$0xff]   ;;  %v1184_v17 = vld [vmem:[%s1461_s1 + $0x60] ss:$16 sps:$4 sm:$0xff]  }
   0x9   :  { %v1191_v18 = vld [vmem:[%s1461_s1 + $0x68] ss:$16 sps:$4 sm:$0xff]   ;;  %v1196_v19 = vld [vmem:[%s1461_s1 + $0x84] ss:$16 sps:$4 sm:$0xff]   ;;  %v1203_v20 = vld [vmem:[%s1461_s1 + $0x8c] ss:$16 sps:$4 sm:$0xff]  }
   0xa   :  { %v1208_v21 = vld [vmem:[%s1461_s1 + $0x80] ss:$16 sps:$4 sm:$0xff]   ;;  %v1213_v22 = vld [vmem:[%s1461_s1 + $0x88] ss:$16 sps:$4 sm:$0xff]   ;;  %v1220_v23 = vld [vmem:[%s1461_s1 + $0xa4] ss:$16 sps:$4 sm:$0xff]  }
   0xb   :  { %231 = vmatpush1.bf16.msra.mxu0 %v1138_v9  ;;  %272 = vmatpush1.bf16.msra.mxu1 %v1144_v10  ;;  %v1227_v24 = vld [vmem:[%s1461_s1 + $0xac] ss:$16 sps:$4 sm:$0xff]   ;;  %v1234_v25 = vld [vmem:[%s1461_s1 + $0xa0] ss:$16 sps:$4 sm:$0xff]   ;;  %v1239_v26 = vld [vmem:[%s1461_s1 + $0xa8] ss:$16 sps:$4 sm:$0xff]  }
   0xc   :  { %232 = vmatprep.subr.bf16.mxu0 %v1150_v11  ;;  %273 = vmatprep.subr.bf16.mxu1 %v1155_v12  ;;  %v1246_v27 = vld [vmem:[%s1461_s1 + $0xc4] ss:$16 sps:$4 sm:$0xff]   ;;  %v1251_v28 = vld [vmem:[%s1461_s1 + $0xcc] ss:$16 sps:$4 sm:$0xff]  }
   0xf   :  { %233 = vmatpush1.bf16.msra.mxu0 %v1160_v13  ;;  %274 = vmatpush1.bf16.msra.mxu1 %v1165_v14 }
  0x10   :  { %234 = vmatprep.subr.bf16.mxu0 %v1172_v15  ;;  %275 = vmatprep.subr.bf16.mxu1 %v1179_v16 }
  0x13   :  { %235 = vmatpush1.bf16.msra.mxu0 %v1184_v17  ;;  %276 = vmatpush1.bf16.msra.mxu1 %v1191_v18 }
  0x14   :  { %236 = vmatprep.subr.bf16.mxu0 %v1196_v19  ;;  %277 = vmatprep.subr.bf16.mxu1 %v1203_v20 }
  0x17   :  { %237 = vmatpush1.bf16.msra.mxu0 %v1208_v21  ;;  %278 = vmatpush1.bf16.msra.mxu1 %v1213_v22 }
  0x18   :  { %238 = vmatprep.subr.bf16.mxu0 %v1220_v23  ;;  %279 = vmatprep.subr.bf16.mxu1 %v1227_v24 }
  0x19   :  { %11 = vsyncpa [#allocation6], 0  ;;  %v1258_v29 = vld [vmem:[%s1461_s1 + $0xc0] ss:$16 sps:$4 sm:$0xff]   ;;  %v1263_v30 = vld [vmem:[%s1461_s1 + $0xc8] ss:$16 sps:$4 sm:$0xff]   ;;  %v61_v37 = vlaneseq }
  0x1a   :  { %v1270_v31 = vld [vmem:[%s1461_s1 + $0xe4] ss:$16 sps:$4 sm:$0xff]   ;;  %v1275_v32 = vld [vmem:[%s1461_s1 + $0xec] ss:$16 sps:$4 sm:$0xff]   ;;  %v1282_v33 = vld [vmem:[%s1461_s1 + $0xe0] ss:$16 sps:$4 sm:$0xff]  }
  0x1b   :  { %239 = vmatpush1.bf16.msra.mxu0 %v1234_v25  ;;  %280 = vmatpush1.bf16.msra.mxu1 %v1239_v26  ;;  %v1287_v34 = vld [vmem:[%s1461_s1 + $0xe8] ss:$16 sps:$4 sm:$0xff]   ;;  %v63_v35 = vld [vmem:[#allocation2] sm:$0x3]  ;;  %v1067_v38 = vmov 1983009808  }
  0x1c   :  { %240 = vmatprep.subr.bf16.mxu0 %v1246_v27  ;;  %281 = vmatprep.subr.bf16.mxu1 %v1251_v28  ;;  %v67_v36 = vpack.c.bf16 %v63_v35, %v63_v35  ;;  %v317_v39 = vunpack.c.l.s4 %v1067_v38  ;;  %v320_v41 = vshrl.u32 %v61_v37, 7  ;;  %v1335_v46 = vld [vmem:[%s1460_s0] sm:$0xff]   ;;  %vm371_vm0 = vcmask 1041408  }
  0x1d   :  { %v66_v55 = vunpack.c.l.bf16 %v1335_v46  ;;  %vm853_vm5 = vcmask 25600  }
  0x1e   :  { %v318_v40 = vunpack.c.0.s8 %v317_v39 }
  0x1f   :  { %241 = vmatpush1.bf16.msra.mxu0 %v1258_v29  ;;  %282 = vmatpush1.bf16.msra.mxu1 %v1263_v30 }
  0x20   :  { %242 = vmatprep.subr.bf16.mxu0 %v1270_v31  ;;  %283 = vmatprep.subr.bf16.mxu1 %v1275_v32  ;;  %v1330_v44 = vsub.s32 %v318_v40, %v320_v41  ;;  %v64_v41 = vld [vmem:[#allocation3] sm:$0x3] }
  0x23   :  { %243 = vmatpush1.bf16.msra.mxu0 %v1282_v33  ;;  %284 = vmatpush1.bf16.msra.mxu1 %v1287_v34 }
  0x24   :  { %393 = vmatprep.subr.bf16.mxu0 %v1100_v1  ;;  %434 = vmatprep.subr.bf16.mxu1 %v1105_v2 }
  0x26   :  { %261 = vmatmul.mubr.bf16.vlgmr.msra.gmra.mrb[0].mxu0 %v67_v36  ;;  %302 = vmatmul.mubr.bf16.vlgmr.msra.gmra.mrb[0].mxu1 %v67_v36 }
  0x27   :  { %394 = vmatpush1.bf16.msra.mxu0 %v1113_v5  ;;  %435 = vmatpush1.bf16.msra.mxu1 %v1118_v6 }
  0x28   :  { %395 = vmatprep.subr.bf16.mxu0 %v1125_v7  ;;  %436 = vmatprep.subr.bf16.mxu1 %v1133_v8 }
  0x29   :  { %425 = vmatprep.mubr.bf16.mxu0 %v1065_v3  ;;  %466 = vmatprep.mubr.bf16.mxu1 %v1065_v3 }
  0x2b   :  { %396 = vmatpush1.bf16.msra.mxu0 %v1138_v9  ;;  %437 = vmatpush1.bf16.msra.mxu1 %v1144_v10 }
  0x2c   :  { %397 = vmatprep.subr.bf16.mxu0 %v1150_v11  ;;  %438 = vmatprep.subr.bf16.mxu1 %v1155_v12 }
  0x2f   :  { %398 = vmatpush1.bf16.msra.mxu0 %v1160_v13  ;;  %439 = vmatpush1.bf16.msra.mxu1 %v1165_v14 }
  0x30   :  { %399 = vmatprep.subr.bf16.mxu0 %v1172_v15  ;;  %440 = vmatprep.subr.bf16.mxu1 %v1179_v16 }
  0x33   :  { %400 = vmatpush1.bf16.msra.mxu0 %v1184_v17  ;;  %441 = vmatpush1.bf16.msra.mxu1 %v1191_v18 }
  0x34   :  { %401 = vmatprep.subr.bf16.mxu0 %v1196_v19  ;;  %442 = vmatprep.subr.bf16.mxu1 %v1203_v20 }
  0x37   :  { %402 = vmatpush1.bf16.msra.mxu0 %v1208_v21  ;;  %443 = vmatpush1.bf16.msra.mxu1 %v1213_v22 }
  0x38   :  { %403 = vmatprep.subr.bf16.mxu0 %v1220_v23  ;;  %444 = vmatprep.subr.bf16.mxu1 %v1227_v24 }
  0x3b   :  { %404 = vmatpush1.bf16.msra.mxu0 %v1234_v25  ;;  %445 = vmatpush1.bf16.msra.mxu1 %v1239_v26 }
  0x3c   :  { %405 = vmatprep.subr.bf16.mxu0 %v1246_v27  ;;  %446 = vmatprep.subr.bf16.mxu1 %v1251_v28 }
  0x3f   :  { %406 = vmatpush1.bf16.msra.mxu0 %v1258_v29  ;;  %447 = vmatpush1.bf16.msra.mxu1 %v1263_v30 }
  0x40   :  { %407 = vmatprep.subr.bf16.mxu0 %v1270_v31  ;;  %448 = vmatprep.subr.bf16.mxu1 %v1275_v32 }
  0x43   :  { %408 = vmatpush1.bf16.msra.mxu0 %v1282_v33  ;;  %449 = vmatpush1.bf16.msra.mxu1 %v1287_v34 }
  0x44   :  { %545 = vmatprep.subr.bf16.mxu0 %v1100_v1  ;;  %586 = vmatprep.subr.bf16.mxu1 %v1105_v2 }
  0xf9   :  { %v262_v42 = vpop.f32.mrb[0].mxu0  ;;  %v303_v43 = vpop.f32.mrb[0].mxu1 }
  0xfa   :  { %v264_v45 = vpop.f32.mrb[1].mxu0  ;;  %v305_v47 = vpop.f32.mrb[1].mxu1 }
  0xfb   :  { %v314_v48 = vcombine.low %v262_v42, %v264_v45  ;;  %v315_v49 = vcombine.low %v303_v43, %v305_v47  ;;  %v266_v50 = vpop.f32.mrb[2].mxu0  ;;  %v307_v51 = vpop.f32.mrb[2].mxu1 }
  0xfc   :  { %v267_v52 = vpop.f32.mrb[3].mxu0  ;;  %v308_v53 = vpop.f32.mrb[3].mxu1 }
  0xfd   :  { %v322_v54 = vrot.slane %v314_v48, %v1330_v44  ;;  %v329_v56 = vrot.slane %v315_v49, %v1330_v44  ;;  %v1346_v52 = vld [vmem:[%s1462_s2] ss:$0 sm:$0xff] }
  0xff   :  { %v330_v57 = vcombine.low %v322_v54, %v329_v56 }
 0x101   :  { %v332_v58 = vadd.f32 %v330_v57, %v66_v55 }
 0x103   :  { %v901_v59 = vmul.f32 -1.442695, %v332_v58  ;;  %v340_v60 = vrot.slane %v332_v58, 2  ;;  %v351_v62 = vrot.slane %v332_v58, 6  ;;  %v348_v4 = vrot.slane %v332_v58, 4 }
 0x105   :  { %973 = vpow2.f32 %v901_v59  ;;  %v902_v61 = vmul.f32 -1.442695, %v340_v60  ;;  %v903_v63 = vmul.f32 -1.442695, %v351_v62 }
 0x107   :  { %975 = vpow2.f32 %v902_v61 }
 0x108   :  { %977 = vpow2.f32 %v903_v63 }
 0x10f   :  { %v974_v0 = vpop.eup %973 }
 0x110   :  { %v336_v35 = vadd.f32 1.0, %v974_v0 }
 0x111   :  { %v976_v36 = vpop.eup %975 }
 0x112   :  { %979 = vrcp.f32 %v336_v35  ;;  %v345_v38 = vadd.f32 1.0, %v976_v36  ;;  %v978_v39 = vpop.eup %977 }
 0x113   :  { %981 = vtanh.f32 %v348_v4  ;;  %v356_v45 = vadd.f32 1.0, %v978_v39 }
 0x114   :  { %983 = vrcp.f32 %v345_v38  ;;  %v391_v38 = vunpack.c.h.bf16 %v1335_v46 }
 0x115   :  { %985 = vrcp.f32 %v356_v45 }
 0x11c   :  { %v980_v40 = vpop.eup %979 }
 0x11d   :  { %v982_v42 = vpop.eup %981 }
 0x11e   :  { %v984_v43 = vpop.eup %983  ;;  %v360_v48 = vmul.f32 %v982_v42, %v980_v40 }
 0x11f   :  { %v359_v47 = vmul.f32 %v984_v43, %v64_v41  ;;  %v986_v50 = vpop.eup %985 }
 0x121   :  { %v1340_v49 = vadd.f32 %v360_v48, %v359_v47 }
 0x123   :  { %987 = vtanh.f32 %v1340_v49 }
 0x12d   :  { %v988_v51 = vpop.eup %987 }
 0x12e   :  { %v363_v53 = vmul.f32 %v988_v51, %v986_v50 }
 0x130   :  { %v392_v54 = vpack.c.bf16 %v363_v53, %v363_v53  ;;  %v370_v55 = vmul.f32 %v1346_v52, %v363_v53 }
 0x132   :  { %426 = vmatmul.mubr.bf16.vlgmr.msra.gmra.mrb[4].mxu0 %v392_v54  ;;  %467 = vmatmul.mubr.bf16.vlgmr.msra.gmra.mrb[4].mxu1 %v392_v54  ;;  %v372_v56 = vsel %vm371_vm0, %v370_v55, 0.0 }
 0x133   :  { %373 = vadd.xlane.f32.xlu0 %v372_v56  ;;  %546 = vmatpush1.bf16.msra.mxu0 %v1113_v5 }
 0x134   :  { %587 = vmatpush1.bf16.msra.mxu1 %v1118_v6  ;;  %547 = vmatprep.subr.bf16.mxu0 %v1125_v7 }
 0x135   :  { %588 = vmatprep.subr.bf16.mxu1 %v1133_v8  ;;  %577 = vmatprep.mubr.bf16.mxu0 %v1065_v3 }
 0x136   :  { %618 = vmatprep.mubr.bf16.mxu1 %v1065_v3 }
 0x137   :  { %548 = vmatpush1.bf16.msra.mxu0 %v1138_v9 }
 0x138   :  { %589 = vmatpush1.bf16.msra.mxu1 %v1144_v10  ;;  %549 = vmatprep.subr.bf16.mxu0 %v1150_v11 }
 0x139   :  { %590 = vmatprep.subr.bf16.mxu1 %v1155_v12 }
 0x13b   :  { %550 = vmatpush1.bf16.msra.mxu0 %v1160_v13 }
 0x13c   :  { %591 = vmatpush1.bf16.msra.mxu1 %v1165_v14  ;;  %551 = vmatprep.subr.bf16.mxu0 %v1172_v15 }
 0x13d   :  { %592 = vmatprep.subr.bf16.mxu1 %v1179_v16 }
 0x13f   :  { %552 = vmatpush1.bf16.msra.mxu0 %v1184_v17 }
 0x140   :  { %593 = vmatpush1.bf16.msra.mxu1 %v1191_v18  ;;  %553 = vmatprep.subr.bf16.mxu0 %v1196_v19 }
 0x141   :  { %594 = vmatprep.subr.bf16.mxu1 %v1203_v20 }
 0x143   :  { %554 = vmatpush1.bf16.msra.mxu0 %v1208_v21 }
 0x144   :  { %595 = vmatpush1.bf16.msra.mxu1 %v1213_v22  ;;  %555 = vmatprep.subr.bf16.mxu0 %v1220_v23 }
 0x145   :  { %596 = vmatprep.subr.bf16.mxu1 %v1227_v24 }
 0x147   :  { %556 = vmatpush1.bf16.msra.mxu0 %v1234_v25 }
 0x148   :  { %597 = vmatpush1.bf16.msra.mxu1 %v1239_v26  ;;  %557 = vmatprep.subr.bf16.mxu0 %v1246_v27 }
 0x149   :  { %598 = vmatprep.subr.bf16.mxu1 %v1251_v28 }
 0x14b   :  { %558 = vmatpush1.bf16.msra.mxu0 %v1258_v29 }
 0x14c   :  { %599 = vmatpush1.bf16.msra.mxu1 %v1263_v30  ;;  %559 = vmatprep.subr.bf16.mxu0 %v1270_v31 }
 0x14d   :  { %600 = vmatprep.subr.bf16.mxu1 %v1275_v32 }
 0x14f   :  { %560 = vmatpush1.bf16.msra.mxu0 %v1282_v33 }
 0x150   :  { %601 = vmatpush1.bf16.msra.mxu1 %v1287_v34  ;;  %697 = vmatprep.subr.bf16.mxu0 %v1100_v1 }
 0x151   :  { %738 = vmatprep.subr.bf16.mxu1 %v1105_v2 }
 0x205   :  { %v427_v57 = vpop.f32.mrb[4].mxu0  ;;  %v468_v58 = vpop.f32.mrb[4].mxu1 }
 0x206   :  { %v429_v59 = vpop.f32.mrb[5].mxu0  ;;  %v470_v60 = vpop.f32.mrb[5].mxu1 }
 0x207   :  { %v479_v61 = vcombine.low %v427_v57, %v429_v59  ;;  %v480_v62 = vcombine.low %v468_v58, %v470_v60  ;;  %v431_v63 = vpop.f32.mrb[6].mxu0  ;;  %v472_v0 = vpop.f32.mrb[6].mxu1 }
 0x208   :  { %v432_v4 = vpop.f32.mrb[7].mxu0  ;;  %v473_v35 = vpop.f32.mrb[7].mxu1 }
 0x209   :  { %v487_v36 = vrot.slane %v479_v61, %v1330_v44  ;;  %v494_v39 = vrot.slane %v480_v62, %v1330_v44 }
 0x20b   :  { %v495_v40 = vcombine.low %v487_v36, %v494_v39 }
 0x20d   :  { %v497_v1 = vadd.f32 %v495_v40, %v391_v38 }
 0x20f   :  { %v907_v41 = vmul.f32 -1.442695, %v497_v1  ;;  %v505_v2 = vrot.slane %v497_v1, 2  ;;  %v516_v43 = vrot.slane %v497_v1, 6  ;;  %v513_v48 = vrot.slane %v497_v1, 4 }
 0x211   :  { %989 = vpow2.f32 %v907_v41  ;;  %v908_v42 = vmul.f32 -1.442695, %v505_v2  ;;  %v909_v45 = vmul.f32 -1.442695, %v516_v43 }
 0x213   :  { %991 = vpow2.f32 %v908_v42 }
 0x214   :  { %993 = vpow2.f32 %v909_v45 }
 0x21b   :  { %v990_v47 = vpop.eup %989 }
 0x21c   :  { %v501_v50 = vadd.f32 1.0, %v990_v47 }
 0x21d   :  { %v992_v51 = vpop.eup %991 }
 0x21e   :  { %995 = vrcp.f32 %v501_v50  ;;  %v510_v53 = vadd.f32 1.0, %v992_v51  ;;  %v994_v46 = vpop.eup %993 }
 0x21f   :  { %997 = vtanh.f32 %v513_v48  ;;  %v521_v57 = vadd.f32 1.0, %v994_v46 }
 0x220   :  { %999 = vrcp.f32 %v510_v53 }
 0x221   :  { %1001 = vrcp.f32 %v521_v57 }
 0x228   :  { %v996_v54 = vpop.eup %995 }
 0x229   :  { %v998_v55 = vpop.eup %997 }
 0x22a   :  { %v1000_v56 = vpop.eup %999  ;;  %v525_v59 = vmul.f32 %v998_v55, %v996_v54 }
 0x22b   :  { %v524_v58 = vmul.f32 %v1000_v56, %v1340_v49  ;;  %v1002_v61 = vpop.eup %1001 }
 0x22d   :  { %v1388_v60 = vadd.f32 %v525_v59, %v524_v58 }
 0x22f   :  { %1003 = vtanh.f32 %v1388_v60 }
 0x239   :  { %v1004_v62 = vpop.eup %1003 }
 0x23a   :  { %v528_v63 = vmul.f32 %v1004_v62, %v1002_v61 }
 0x23c   :  { %v544_v0 = vpack.c.bf16 %v528_v63, %v528_v63  ;;  %v529_v4 = vmul.f32 %v1346_v52, %v528_v63 }
 0x23e   :  { %578 = vmatmul.mubr.bf16.vlgmr.msra.gmra.mrb[8].mxu0 %v544_v0  ;;  %619 = vmatmul.mubr.bf16.vlgmr.msra.gmra.mrb[8].mxu1 %v544_v0  ;;  %v530_v35 = vsel %vm371_vm0, %v529_v4, 0.0 }
 0x23f   :  { %531 = vadd.xlane.f32.xlu0 %v530_v35  ;;  %698 = vmatpush1.bf16.msra.mxu0 %v1113_v5  ;;  %v374_v5 = vpop.xlane.xlu0 %373 }
 0x240   :  { %739 = vmatpush1.bf16.msra.mxu1 %v1118_v6  ;;  %699 = vmatprep.subr.bf16.mxu0 %v1125_v7 }
 0x241   :  { %740 = vmatprep.subr.bf16.mxu1 %v1133_v8  ;;  %729 = vmatprep.mubr.bf16.mxu0 %v1065_v3 }
 0x242   :  { %770 = vmatprep.mubr.bf16.mxu1 %v1065_v3  ;;  %v1412_v3 = vld [vmem:[#allocation4] ss:$0 sm:$0xff] }
 0x243   :  { %700 = vmatpush1.bf16.msra.mxu0 %v1138_v9  ;;  %v381_v6 = vadd.f32 %v1412_v3, %v374_v5 }
 0x244   :  { %741 = vmatpush1.bf16.msra.mxu1 %v1144_v10  ;;  %701 = vmatprep.subr.bf16.mxu0 %v1150_v11  ;;  %v1431_v10 = vld [vmem:[%s1460_s0 + $0x8] sm:$0xff]   ;;  %s1068_s0 = smov [#allocation5]  }
 0x245   :  { %742 = vmatprep.subr.bf16.mxu1 %v1155_v12  ;;  %s861_s30 = sshll.u32 %s1068_s0, 4  ;;  %s862_s30 = int_to_ptr.vmem [resolvable:$true] %s861_s30 }
 0x246   :  { %s1041_s5 = scalar_lea.vmem %s862_s30, 32  ;;  %p1046_p1 = scmp.lt.s32.totalorder %s862_s30, %s862_s30 }
 0x247   :  { %702 = vmatpush1.bf16.msra.mxu0 %v1160_v13  ;;  %p1042_p0 = scmp.ne.s32.totalorder %s862_s30, %s1041_s5  ;;  %p1047_p2 = scmp.lt.s32.totalorder %s1041_s5, %s1041_s5 }
 0x248   :  { %743 = vmatpush1.bf16.msra.mxu1 %v1165_v14  ;;  %703 = vmatprep.subr.bf16.mxu0 %v1172_v15 }
 0x249   :  { %744 = vmatprep.subr.bf16.mxu1 %v1179_v16  ;;  %p1048_p3 = por %p1047_p2, %p1046_p1 }
 0x24b   :  { %704 = vmatpush1.bf16.msra.mxu0 %v1184_v17  ;;  %p1049_p4 = pnand %p1048_p3, %p1042_p0 }
 0x24c   :  { %745 = vmatpush1.bf16.msra.mxu1 %v1191_v18  ;;  %705 = vmatprep.subr.bf16.mxu0 %v1196_v19  ;;  %v543_v19 = vunpack.c.l.bf16 %v1431_v10 }
 0x24d   :  { %746 = vmatprep.subr.bf16.mxu1 %v1203_v20 }
 0x24f   :  { %706 = vmatpush1.bf16.msra.mxu0 %v1208_v21 }
 0x250   :  { %747 = vmatpush1.bf16.msra.mxu1 %v1213_v22  ;;  %707 = vmatprep.subr.bf16.mxu0 %v1220_v23 }
 0x251   :  { %748 = vmatprep.subr.bf16.mxu1 %v1227_v24 }
 0x253   :  { %708 = vmatpush1.bf16.msra.mxu0 %v1234_v25 }
 0x254   :  { %749 = vmatpush1.bf16.msra.mxu1 %v1239_v26  ;;  %709 = vmatprep.subr.bf16.mxu0 %v1246_v27 }
 0x255   :  { %385 = vperm.xlu0 %923, %v381_v6   ;;  %750 = vmatprep.subr.bf16.mxu1 %v1251_v28 }
 0x257   :  { %710 = vmatpush1.bf16.msra.mxu0 %v1258_v29 }
 0x258   :  { %751 = vmatpush1.bf16.msra.mxu1 %v1263_v30  ;;  %711 = vmatprep.subr.bf16.mxu0 %v1270_v31 }
 0x259   :  { %752 = vmatprep.subr.bf16.mxu1 %v1275_v32 }
 0x25b   :  { %712 = vmatpush1.bf16.msra.mxu0 %v1282_v33 }
 0x25c   :  { %753 = vmatpush1.bf16.msra.mxu1 %v1287_v34 }
 0x311   :  { %v579_v7 = vpop.f32.mrb[8].mxu0  ;;  %v620_v8 = vpop.f32.mrb[8].mxu1 }
 0x312   :  { %v581_v9 = vpop.f32.mrb[9].mxu0  ;;  %v622_v11 = vpop.f32.mrb[9].mxu1 }
 0x313   :  { %v631_v12 = vcombine.low %v579_v7, %v581_v9  ;;  %v632_v13 = vcombine.low %v620_v8, %v622_v11  ;;  %v583_v14 = vpop.f32.mrb[10].mxu0  ;;  %v624_v15 = vpop.f32.mrb[10].mxu1 }
 0x314   :  { %v584_v16 = vpop.f32.mrb[11].mxu0  ;;  %v625_v17 = vpop.f32.mrb[11].mxu1 }
 0x315   :  { %v639_v18 = vrot.slane %v631_v12, %v1330_v44  ;;  %v646_v20 = vrot.slane %v632_v13, %v1330_v44 }
 0x317   :  { %v647_v21 = vcombine.low %v639_v18, %v646_v20 }
 0x319   :  { %v649_v22 = vadd.f32 %v647_v21, %v543_v19 }
 0x31b   :  { %v911_v23 = vmul.f32 -1.442695, %v649_v22  ;;  %v657_v24 = vrot.slane %v649_v22, 2  ;;  %v668_v26 = vrot.slane %v649_v22, 6  ;;  %v665_v29 = vrot.slane %v649_v22, 4 }
 0x31d   :  { %1005 = vpow2.f32 %v911_v23  ;;  %v912_v25 = vmul.f32 -1.442695, %v657_v24  ;;  %v913_v27 = vmul.f32 -1.442695, %v668_v26  ;;  %v532_v24 = vpop.xlane.xlu0 %531 }
 0x31f   :  { %1007 = vpow2.f32 %v912_v25  ;;  %v533_v25 = vadd.f32 %v1412_v3, %v532_v24 }
 0x320   :  { %1009 = vpow2.f32 %v913_v27 }
 0x327   :  { %v1006_v28 = vpop.eup %1005 }
 0x328   :  { %v653_v30 = vadd.f32 1.0, %v1006_v28 }
 0x329   :  { %v1008_v31 = vpop.eup %1007 }
 0x32a   :  { %1011 = vrcp.f32 %v653_v30  ;;  %v662_v32 = vadd.f32 1.0, %v1008_v31  ;;  %v1010_v33 = vpop.eup %1009  ;;  %v62_v31 = vand.u32 127, %v61_v37 }
 0x32b   :  { %1013 = vtanh.f32 %v665_v29  ;;  %v673_v38 = vadd.f32 1.0, %v1010_v33 }
 0x32c   :  { %1015 = vrcp.f32 %v662_v32  ;;  %vm382_vm1 = vcmp.eq.s32.totalorder %v62_v31, 0  ;;  %vm534_vm2 = vcmp.eq.s32.totalorder %v62_v31, 1  ;;  %vm686_vm3 = vcmp.eq.s32.totalorder %v62_v31, 2 }
 0x32d   :  { %1017 = vrcp.f32 %v673_v38  ;;  %vm838_vm4 = vcmp.eq.s32.totalorder %v62_v31, 3 }
 0x334   :  { %v1012_v34 = vpop.eup %1011 }
 0x335   :  { %v1014_v49 = vpop.eup %1013 }
 0x336   :  { %v1016_v36 = vpop.eup %1015  ;;  %v677_v40 = vmul.f32 %v1014_v49, %v1012_v34 }
 0x337   :  { %v676_v39 = vmul.f32 %v1016_v36, %v1388_v60  ;;  %v1018_v41 = vpop.eup %1017  ;;  %v695_v60 = vunpack.c.h.bf16 %v1431_v10 }
 0x339   :  { %v678_v1 = vadd.f32 %v677_v40, %v676_v39 }
 0x33b   :  { %1019 = vtanh.f32 %v678_v1 }
 0x345   :  { %v1020_v2 = vpop.eup %1019 }
 0x346   :  { %v680_v42 = vmul.f32 %v1020_v2, %v1018_v41 }
 0x348   :  { %v696_v43 = vpack.c.bf16 %v680_v42, %v680_v42  ;;  %v681_v45 = vmul.f32 %v1346_v52, %v680_v42 }
 0x34a   :  { %730 = vmatmul.mubr.bf16.vlgmr.msra.gmra.mrb[12].mxu0 %v696_v43  ;;  %771 = vmatmul.mubr.bf16.vlgmr.msra.gmra.mrb[12].mxu1 %v696_v43  ;;  %v682_v47 = vsel %vm371_vm0, %v681_v45, 0.0 }
 0x34b   :  { %683 = vadd.xlane.f32.xlu1 %v682_v47 }
 0x3d8   :  { %v684_v26 = vpop.xlane.xlu1 %683 }
 0x3d9   :  { %v685_v27 = vadd.f32 %v1412_v3, %v684_v26 }
 0x41d   :  { %v731_v48 = vpop.f32.mrb[12].mxu0  ;;  %v772_v50 = vpop.f32.mrb[12].mxu1 }
 0x41e   :  { %v733_v51 = vpop.f32.mrb[13].mxu0  ;;  %v774_v53 = vpop.f32.mrb[13].mxu1 }
 0x41f   :  { %v783_v46 = vcombine.low %v731_v48, %v733_v51  ;;  %v784_v54 = vcombine.low %v772_v50, %v774_v53  ;;  %v735_v55 = vpop.f32.mrb[14].mxu0  ;;  %v776_v56 = vpop.f32.mrb[14].mxu1 }
 0x420   :  { %v736_v57 = vpop.f32.mrb[15].mxu0  ;;  %v777_v58 = vpop.f32.mrb[15].mxu1 }
 0x421   :  { %v791_v59 = vrot.slane %v783_v46, %v1330_v44  ;;  %v798_v61 = vrot.slane %v784_v54, %v1330_v44 }
 0x423   :  { %v799_v62 = vcombine.low %v791_v59, %v798_v61 }
 0x425   :  { %v801_v63 = vadd.f32 %v799_v62, %v695_v60 }
 0x427   :  { %v915_v0 = vmul.f32 -1.442695, %v801_v63  ;;  %v809_v4 = vrot.slane %v801_v63, 2  ;;  %v820_v5 = vrot.slane %v801_v63, 6  ;;  %v817_v8 = vrot.slane %v801_v63, 4 }
 0x429   :  { %1021 = vpow2.f32 %v915_v0  ;;  %v916_v35 = vmul.f32 -1.442695, %v809_v4  ;;  %v917_v6 = vmul.f32 -1.442695, %v820_v5 }
 0x42b   :  { %1023 = vpow2.f32 %v916_v35 }
 0x42c   :  { %1025 = vpow2.f32 %v917_v6 }
 0x433   :  { %v1022_v7 = vpop.eup %1021 }
 0x434   :  { %v805_v9 = vadd.f32 1.0, %v1022_v7 }
 0x435   :  { %v1024_v11 = vpop.eup %1023 }
 0x436   :  { %1027 = vrcp.f32 %v805_v9  ;;  %v814_v12 = vadd.f32 1.0, %v1024_v11  ;;  %v1026_v10 = vpop.eup %1025 }
 0x437   :  { %1029 = vtanh.f32 %v817_v8  ;;  %v825_v15 = vadd.f32 1.0, %v1026_v10 }
 0x438   :  { %1031 = vrcp.f32 %v814_v12 }
 0x439   :  { %1033 = vrcp.f32 %v825_v15 }
 0x440   :  { %v1028_v44 = vpop.eup %1027 }
 0x441   :  { %v1030_v13 = vpop.eup %1029 }
 0x442   :  { %v1032_v14 = vpop.eup %1031  ;;  %v829_v17 = vmul.f32 %v1030_v13, %v1028_v44 }
 0x443   :  { %v828_v16 = vmul.f32 %v1032_v14, %v678_v1  ;;  %v1034_v19 = vpop.eup %1033 }
 0x445   :  { %v830_v18 = vadd.f32 %v829_v17, %v828_v16 }
 0x447   :  { %1035 = vtanh.f32 %v830_v18  ;;  %846 = vst [vmem:[#allocation3] sm:$0x3] %v830_v18 }
 0x451   :  { %v1036_v20 = vpop.eup %1035 }
 0x452   :  { %v832_v21 = vmul.f32 %v1036_v20, %v1034_v19 }
 0x454   :  { %v833_v22 = vmul.f32 %v1346_v52, %v832_v21  ;;  %845 = vst [vmem:[#allocation2] sm:$0x3] %v832_v21  ;;  %v386_v52 = vpop.permute.xlu0 %385 }
 0x455   :  { %v388_v33 = vsel %vm382_vm1, %v386_v52, 0.0 }
 0x456   :  { %v834_v23 = vsel %vm371_vm0, %v833_v22, 0.0 }
 0x457   :  { %835 = vadd.xlane.f32.xlu1 %v834_v23 }
 0x468   :  { %537 = vperm.xlu1 %924, %v533_v25  }
 0x46c   :  { %689 = vperm.xlu1 %924, %v685_v27  }
 0x4e4   :  { %v836_v28 = vpop.xlane.xlu1 %835 }
 0x4e5   :  { %v837_v29 = vadd.f32 %v1412_v3, %v836_v28 }
 0x4e7   :  { %841 = vperm.xlu1 %924, %v837_v29  }
 0x4e8   :  { %v538_v30 = vpop.permute.xlu1 %537 }
 0x4e9   :  { %v540_v34 = vsel %vm534_vm2, %v538_v30, %v388_v33 }
 0x4ec   :  { %v690_v32 = vpop.permute.xlu1 %689 }
 0x4ed   :  { %v692_v49 = vsel %vm686_vm3, %v690_v32, %v540_v34 }
 0x566   :  { %v842_v36 = vpop.permute.xlu1 %841 }
 0x567   :  { %v844_v38 = vsel %vm838_vm4, %v842_v36, %v692_v49 }
 0x568   :  { %v918_v39 = vmul.f32 -1.442695, %v844_v38 }
 0x56a   :  { %1037 = vpow2.f32 %v918_v39 }
 0x574   :  { %v1038_v40 = vpop.eup %1037 }
 0x575   :  { %v850_v1 = vadd.f32 1.0, %v1038_v40 }
 0x577   :  { %1039 = vrcp.f32 %v850_v1 }
 0x581   :  { %v1040_v37 = vpop.eup %1039 }
 0x582   :  { %854 = vst.msk [vmem:[#allocation5] sm:$0x3] %vm853_vm5, %v1040_v37 }
 0x583   :  { %1052 = shalt.err (!%p1049_p4)
}
 0x584   :  { %s1053_s8 = scalar_lea.hbm %s1464_s4, 32 }
 0x585   :  { %p1054_p5 = scmp.ne.s32.totalorder %s1464_s4, %s1053_s8  ;;  %p1057_p6 = scmp.lt.u32.totalorder %s1053_s8, %s1464_s4 }
 0x587   :  { %p1059_p7 = pnand %p1057_p6, %p1054_p5 }
 0x589   :  { %1062 = shalt.err (!%p1059_p7)
}
 0x58a   :  { %864 = dma.vmem_to_hbm [thread:$0]  %s862_s30, 32, %s1464_s4, [#allocation6]  }
 0x58b   :  { %1063 = dma.done.wait [#allocation6], 32  }
 0x58c   :  { %1064 = vsyncadd [#allocation6], 4294967264 }
 0x58d   :  { %868 = vsyncpa [#allocation6], 1 }

// kernel: _lambda_.2
= control target key start
LH: loop header
LB: loop body
LE: loop exit
PB: predicated region body
PF: predicated region fallthrough
CT: control target
= control target key end

     0   :  { %vm70_vm0 = vcmask 261120   ;;  %vm136_vm1 = vcmask 257024   ;;  %v1381_v4 = vmov 0.0   ;;  %vm161_vm2 = vcmask 523264   ;;  %s1383_s26 = smov 64   ;;  %s1384_s29 = smov 32   ;;  %s1719_s1 = inlined_call_operand.vmem [shape: bf16[32,32], index: 1, kind: input, shape index: {}]   ;;  %s1720_s0 = inlined_call_operand.vmem [shape: bf16[32,32], index: 0, kind: input, shape index: {}]   ;;  %s1721_s3 = inlined_call_operand.vmem [shape: bf16[96,64], index: 3, kind: input, shape index: {}]   ;;  %s1722_s2 = inlined_call_operand.vmem [shape: f32[1,32], index: 2, kind: input, shape index: {}]   ;;  %s1723_s5 = inlined_call_operand.vmem [shape: bf16[192,128], index: 5, kind: input, shape index: {}]   ;;  %s1724_s4 = inlined_call_operand.vmem [shape: f32[1,64], index: 4, kind: input, shape index: {}]   ;;  %s1725_s7 = inlined_call_operand.vmem [shape: bf16[128,512], index: 7, kind: input, shape index: {}]   ;;  %s1726_s6 = inlined_call_operand.vmem [shape: f32[1,128], index: 6, kind: input, shape index: {}]   ;;  %s1727_s8 = inlined_call_operand.vmem [shape: f32[1,512], index: 8, kind: input, shape index: {}]   ;;  %s1728_s9 = inlined_call_operand.vmem [shape: bf16[4,1024], index: 9, kind: output, shape index: {}]  }
   0x1   :  { %v1308_v0 = vld [vmem:[%s1719_s1] sm:$0xff]   ;;  %v1309_v1 = vld [vmem:[%s1719_s1 + $0x8] sm:$0xff]   ;;  %134 = vst.msk [vmem:[#allocation3] sm:$0xff] %vm70_vm0, %v1381_v4  ;;  %135 = vst.msk [vmem:[#allocation3 + $0x8] sm:$0xff] %vm70_vm0, %v1381_v4  ;;  %vm1382_vm3 = vmmov 0   ;;  %vm164_vm4 = vcmask 781312  }
   0x2   :  { %1273 = vmatprep.subr.bf16.mxu1 %v1308_v0  ;;  %v1310_v2 = vld [vmem:[%s1720_s0] sm:$0xff]   ;;  %v1311_v3 = vld [vmem:[%s1720_s0 + $0x8] sm:$0xff]   ;;  %137 = vst.msk [vmem:[#allocation3 + $0x10] sm:$0xf] %vm136_vm1, %v1381_v4  ;;  %v1314_v25 = vld [vmem:[%s1721_s3 + $0x10] sm:$0xff]   ;;  %vm183_vm5 = vcmask 785412  }
   0x3   :  { %1274 = vmatpush3.bf16.msra.mxu1 %v1308_v0  ;;  %1277 = vmatprep.mubr.msk.bf16.mxu1 %vm70_vm0, %v1310_v2  ;;  %v1312_v5 = vld [vmem:[%s1721_s3] sm:$0xff]   ;;  %v1313_v19 = vld [vmem:[%s1721_s3 + $0x8] sm:$0xff]   ;;  %290 = vst.msk [vmem:[#allocation6] sm:$0xff] %vm161_vm2, %v1381_v4  ;;  %v1315_v27 = vld [vmem:[%s1721_s3 + $0x18] sm:$0xff]   ;;  %vm241_vm6 = vcmask 785408   ;;  %vm291_vm7 = vcmask 519168  }
   0x4   :  { %1275 = vmatprep.subr.bf16.mxu1 %v1309_v1  ;;  %v1158_v6 = vld [vmem:[%s1722_s2] ss:$0 sm:$0xff]  ;;  %v1317_v33 = vld [vmem:[%s1721_s3 + $0x28] sm:$0xff]   ;;  %292 = vst.msk [vmem:[#allocation6 + $0x8] sm:$0xf] %vm291_vm7, %v1381_v4  ;;  %v1385_v50 = vmov 0  }
   0x5   :  { %v1316_v28 = vld [vmem:[%s1721_s3 + $0x20] sm:$0xff]   ;;  %458 = vmatprep.subr.bf16.mxu0 %v1385_v50  ;;  %v1319_v52 = vld [vmem:[%s1723_s5 + $0x8] sm:$0xff]   ;;  %v1320_v53 = vld [vmem:[%s1723_s5 + $0x10] sm:$0xff]   ;;  %vm320_vm8 = vcmask 1041408   ;;  %vm321_vm9 = vcmask 521220   ;;  %vm341_vm11 = vcmask 1043458  }
   0x6   :  { %v1318_v51 = vld [vmem:[%s1723_s5] sm:$0xff]   ;;  %v1321_v54 = vld [vmem:[%s1723_s5 + $0x18] sm:$0xff]   ;;  %v1323_v56 = vld [vmem:[%s1723_s5 + $0x28] sm:$0xff]   ;;  %vm342_vm12 = vcmask 523270  }
   0x7   :  { %1276 = vmatpush3.bf16.msra.mxu1 %v1309_v1  ;;  %459 = vmatpush1.bf16.msra.mxu0 %v1318_v51  ;;  %v1322_v55 = vld [vmem:[%s1723_s5 + $0x20] sm:$0xff]   ;;  %v1324_v57 = vld [vmem:[%s1723_s5 + $0x30] sm:$0xff]   ;;  %v1325_v58 = vld [vmem:[%s1723_s5 + $0x38] sm:$0xff]  }
   0x8   :  { %1281 = vmatprep.subr.bf16.mxu1 %v1381_v4  ;;  %460 = vmatprep.subr.bf16.mxu0 %v1385_v50  ;;  %v1165_v59 = vld [vmem:[%s1724_s4] ss:$0 sm:$0xff]  ;;  %vm322_vm10 = vmor %vm321_vm9, %vm320_vm8  ;;  %v1364_v51 = vld [vmem:[%s1725_s7 + $0xa4] ss:$16 sps:$4 sm:$0xff]  }
   0x9   :  { %vm343_vm13 = vmor %vm342_vm12, %vm341_vm11 }
   0xa   :  { %1278 = vmatmul.mubr.msk.bf16.vlgmr.msra.gmra.mrb[0].mxu1 %vm70_vm0, %v1311_v3 }
   0xb   :  { %1282 = vmatpush3.bf16.msra.mxu1 %v1312_v5  ;;  %1293 = vmatprep.mubr.msk.bf16.mxu1 %vm1382_vm3, %v1381_v4 }
   0xc   :  { %1283 = vmatprep.subr.bf16.mxu1 %v1381_v4  ;;  %461 = vmatpush1.bf16.msra.mxu0 %v1319_v52  ;;  %v1367_v52 = vld [vmem:[%s1725_s7 + $0xac] ss:$16 sps:$4 sm:$0xff]  }
   0xd   :  { %462 = vmatprep.subr.bf16.mxu0 %v1385_v50 }
   0xf   :  { %1284 = vmatpush3.bf16.msra.mxu1 %v1313_v19  ;;  %v1577_v19 = vld [vmem:[%s1725_s7 + $0x24] ss:$16 sps:$4 sm:$0xff]  }
  0x10   :  { %1285 = vmatprep.subr.bf16.mxu1 %v1381_v4  ;;  %463 = vmatpush1.bf16.msra.mxu0 %v1320_v53  ;;  %v1362_v53 = vld [vmem:[%s1725_s7 + $0xa0] ss:$16 sps:$4 sm:$0xff]  }
  0x11   :  { %464 = vmatprep.subr.bf16.mxu0 %v1385_v50 }
  0x13   :  { %1286 = vmatpush3.bf16.msra.mxu1 %v1314_v25  ;;  %v1614_v25 = vld [vmem:[%s1725_s7 + $0x84] ss:$16 sps:$4 sm:$0xff]  }
  0x14   :  { %1287 = vmatprep.subr.bf16.mxu1 %v1381_v4  ;;  %465 = vmatpush1.bf16.msra.mxu0 %v1321_v54  ;;  %v1365_v54 = vld [vmem:[%s1725_s7 + $0xa8] ss:$16 sps:$4 sm:$0xff]  }
  0x15   :  { %466 = vmatprep.subr.bf16.mxu0 %v1385_v50 }
  0x17   :  { %1288 = vmatpush3.bf16.msra.mxu1 %v1315_v27 }
  0x18   :  { %1289 = vmatprep.subr.bf16.mxu1 %v1381_v4  ;;  %467 = vmatpush1.bf16.msra.mxu0 %v1322_v55  ;;  %v1370_v55 = vld [vmem:[%s1725_s7 + $0xc4] ss:$16 sps:$4 sm:$0xff]  }
  0x19   :  { %468 = vmatprep.subr.bf16.mxu0 %v1385_v50 }
  0x1b   :  { %1290 = vmatpush3.bf16.msra.mxu1 %v1316_v28 }
  0x1c   :  { %1291 = vmatprep.subr.bf16.mxu1 %v1381_v4  ;;  %469 = vmatpush1.bf16.msra.mxu0 %v1323_v56  ;;  %v1326_v4 = vld [vmem:[%s1723_s5 + $0x40] sm:$0xff]   ;;  %v1373_v56 = vld [vmem:[%s1725_s7 + $0xcc] ss:$16 sps:$4 sm:$0xff]  }
  0x1d   :  { %470 = vmatprep.subr.bf16.mxu0 %v1385_v50 }
  0x1f   :  { %1292 = vmatpush3.bf16.msra.mxu1 %v1317_v33 }
  0x20   :  { %471 = vmatpush1.bf16.msra.mxu0 %v1324_v57  ;;  %v1368_v57 = vld [vmem:[%s1725_s7 + $0xc0] ss:$16 sps:$4 sm:$0xff]  }
  0x21   :  { %472 = vmatprep.subr.bf16.mxu0 %v1385_v50 }
  0x24   :  { %473 = vmatpush1.bf16.msra.mxu0 %v1325_v58  ;;  %v1371_v58 = vld [vmem:[%s1725_s7 + $0xc8] ss:$16 sps:$4 sm:$0xff]  }
  0x25   :  { %474 = vmatprep.subr.bf16.mxu0 %v1385_v50 }
  0x28   :  { %475 = vmatpush1.bf16.msra.mxu0 %v1326_v4 }
  0x29   :  { %476 = vmatprep.subr.bf16.mxu0 %v1385_v50 }
  0xdd   :  { %v1279_v7 = vpop.f32.mrb[0].mxu1 }
  0xde   :  { %v120_v8 = vadd.f32 %v1279_v7, %v1158_v6  ;;  %v111_v9 = vpop.f32.mrb[1].mxu1 }
  0xdf   :  { %v112_v10 = vadd.f32 %v1158_v6, %v111_v9  ;;  %v1280_v11 = vpop.f32.mrb[2].mxu1 }
  0xe0   :  { %v128_v12 = vmax.f32 %v120_v8, 0.0  ;;  %v123_v13 = vadd.f32 %v1280_v11, %v1158_v6  ;;  %v114_v14 = vpop.f32.mrb[3].mxu1  ;;  %v1327_v11 = vld [vmem:[%s1723_s5 + $0x48] sm:$0xff]  }
  0xe1   :  { %v126_v15 = vmax.f32 %v112_v10, 0.0  ;;  %v115_v16 = vadd.f32 %v1158_v6, %v114_v14  ;;  %477 = vmatpush1.bf16.msra.mxu0 %v1327_v11 }
  0xe2   :  { %132 = vst.msk [vmem:[#allocation2 + $0x10] sm:$0xff] %vm70_vm0, %v128_v12  ;;  %v129_v17 = vmax.f32 %v123_v13, 0.0  ;;  %v1328_v12 = vld [vmem:[%s1723_s5 + $0x50] sm:$0xff]   ;;  %478 = vmatprep.subr.bf16.mxu0 %v1385_v50  ;;  %v1329_v13 = vld [vmem:[%s1723_s5 + $0x58] sm:$0xff]  }
  0xe3   :  { %130 = vst.msk [vmem:[#allocation2] sm:$0xff] %vm70_vm0, %v126_v15  ;;  %v127_v18 = vmax.f32 %v115_v16, 0.0  ;;  %v1561_v16 = vld [vmem:[%s1725_s7] ss:$16 sps:$4 sm:$0xff]  }
  0xe4   :  { %133 = vst.msk [vmem:[#allocation2 + $0x18] sm:$0xff] %vm70_vm0, %v129_v17  ;;  %v1566_v17 = vld [vmem:[%s1725_s7 + $0x4] ss:$16 sps:$4 sm:$0xff]  }
  0xe5   :  { %131 = vst.msk [vmem:[#allocation2 + $0x8] sm:$0xff] %vm70_vm0, %v127_v18  ;;  %479 = vmatpush1.bf16.msra.mxu0 %v1328_v12  ;;  %v1571_v18 = vld [vmem:[%s1725_s7 + $0xc] ss:$16 sps:$4 sm:$0xff]   ;;  %716 = vmatprep.subr.bf16.mxu1 %v1566_v17 }
  0xe6   :  { %480 = vmatprep.subr.bf16.mxu0 %v1385_v50 }
  0xe9   :  { %481 = vmatpush1.bf16.msra.mxu0 %v1329_v13  ;;  %v534_v13 = vld [vmem:[%s1727_s8] sm:$0xf] }
  0xea   :  { %757 = vmatprep.subr.bf16.mxu0 %v1571_v18 }
  0xeb   :  { %v144_v20 = vld [vmem:[#allocation2 + $0x10] ss:$2 sm:$0xff]  ;;  %v146_v21 = vld [vmem:[#allocation2 + $0x11] ss:$2 sm:$0xff] }
  0xec   :  { %v147_v22 = vmax.f32 %v144_v20, %v146_v21  ;;  %v138_v23 = vld [vmem:[#allocation2] ss:$2 sm:$0xff]  ;;  %v140_v24 = vld [vmem:[#allocation2 + $0x1] ss:$2 sm:$0xff] }
  0xed   :  { %v141_v26 = vmax.f32 %v138_v23, %v140_v24  ;;  %v1584_v20 = vld [vmem:[%s1725_s7 + $0x20] ss:$16 sps:$4 sm:$0xff]   ;;  %v1590_v21 = vld [vmem:[%s1725_s7 + $0x44] ss:$16 sps:$4 sm:$0xff]  }
  0xee   :  { %148 = vst.msk [vmem:[#allocation3 + $0xb] sm:$0xff] %vm70_vm0, %v147_v22  ;;  %v1596_v22 = vld [vmem:[%s1725_s7 + $0x40] ss:$16 sps:$4 sm:$0xff]   ;;  %v1602_v23 = vld [vmem:[%s1725_s7 + $0x64] ss:$16 sps:$4 sm:$0xff]  }
  0xef   :  { %142 = vst.msk [vmem:[#allocation3 + $0x1] sm:$0xff] %vm70_vm0, %v141_v26  ;;  %v1608_v24 = vld [vmem:[%s1725_s7 + $0x60] ss:$16 sps:$4 sm:$0xff]  }
  0xf0   :  { %v1619_v26 = vld [vmem:[%s1725_s7 + $0x80] ss:$16 sps:$4 sm:$0xff]  }
  0xf5   :  { %v167_v29 = vld [vmem:[#allocation3 + $0xb] sm:$0xff] }
  0xf6   :  { %v151_v30 = vld [vmem:[#allocation3 + $0x2] sm:$0xff]  ;;  %v168_v34 = vld [vmem:[#allocation3 + $0xc] sm:$0xff] }
  0xf7   :  { %v150_v31 = vld [vmem:[#allocation3 + $0x1] sm:$0xff]  ;;  %157 = vrot.lane.b32.xlu1 %v151_v30, %s1383_s26  ;;  %v166_v39 = vld [vmem:[#allocation3 + $0xa] sm:$0xff] }
  0xf8   :  { %v1303_v32 = vpack.i.bf16 %v150_v31, %v167_v29  ;;  %v149_v38 = vld [vmem:[#allocation3] sm:$0xff] }
  0xfa   :  { %1304 = vrot.lane.b32.xlu0 %v1303_v32, %s1384_s29 }
  0xfe   :  { %174 = vrot.lane.b32.xlu0 %v168_v34, %s1383_s26 }
 0x169   :  { %v158_v40 = vpop.permute.xlu1 %157 }
 0x16c   :  { %v1305_v35 = vpop.permute.xlu0 %1304 }
 0x16d   :  { %v1307_v36 = vunpack.i.h.bf16 %v1305_v35  ;;  %v1306_v37 = vunpack.i.l.bf16 %v1305_v35 }
 0x16f   :  { %v160_v41 = vsel %vm70_vm0, %v149_v38, %v1307_v36  ;;  %v177_v42 = vsel %vm70_vm0, %v166_v39, %v1306_v37 }
 0x170   :  { %v162_v43 = vsel %vm161_vm2, %v160_v41, %v158_v40  ;;  %v175_v44 = vpop.permute.xlu0 %174  ;;  %v1335_v41 = vld [vmem:[%s1725_s7 + $0x8] ss:$16 sps:$4 sm:$0xff]  }
 0x171   :  { %v163_v45 = vpack.c.bf16 %v162_v43, %v162_v43  ;;  %v178_v46 = vsel %vm161_vm2, %v177_v42, %v175_v44  ;;  %v1343_v42 = vld [vmem:[%s1725_s7 + $0x2c] ss:$16 sps:$4 sm:$0xff]   ;;  %v1341_v43 = vld [vmem:[%s1725_s7 + $0x28] ss:$16 sps:$4 sm:$0xff]  }
 0x172   :  { %v179_v47 = vpack.c.bf16 %v178_v46, %v178_v46  ;;  %v1349_v44 = vld [vmem:[%s1725_s7 + $0x4c] ss:$16 sps:$4 sm:$0xff]  }
 0x173   :  { %165 = vst.msk [vmem:[#allocation4] sm:$0xf] %vm164_vm4, %v163_v45  ;;  %v1347_v45 = vld [vmem:[%s1725_s7 + $0x48] ss:$16 sps:$4 sm:$0xff]   ;;  %v1355_v46 = vld [vmem:[%s1725_s7 + $0x6c] ss:$16 sps:$4 sm:$0xff]  }
 0x174   :  { %v181_v48 = vrot.slane %v179_v47, 4  ;;  %v1353_v47 = vld [vmem:[%s1725_s7 + $0x68] ss:$16 sps:$4 sm:$0xff]  }
 0x176   :  { %184 = vst.msk [vmem:[#allocation4] sm:$0xf0] %vm183_vm5, %v181_v48  ;;  %v1361_v48 = vld [vmem:[%s1725_s7 + $0x8c] ss:$16 sps:$4 sm:$0xff]  }
 0x17d   :  { %v185_v49 = vld [vmem:[#allocation4] sm:$0xff] }
 0x17e   :  { %1294 = vmatmul.mubr.msk.bf16.vlgmr.msra.gmra.mrb[4].mxu1 %vm241_vm6, %v185_v49  ;;  %v1359_v49 = vld [vmem:[%s1725_s7 + $0x88] ss:$16 sps:$4 sm:$0xff]  }
 0x17f   :  { %748 = vmatprep.mubr.bf16.mxu1 %v1385_v50  ;;  %717 = vmatpush1.bf16.msra.mxu1 %v1561_v16 }
 0x180   :  { %718 = vmatprep.subr.bf16.mxu1 %v1577_v19 }
 0x183   :  { %719 = vmatpush1.bf16.msra.mxu1 %v1584_v20 }
 0x184   :  { %720 = vmatprep.subr.bf16.mxu1 %v1590_v21 }
 0x187   :  { %721 = vmatpush1.bf16.msra.mxu1 %v1596_v22 }
 0x188   :  { %722 = vmatprep.subr.bf16.mxu1 %v1602_v23 }
 0x18b   :  { %723 = vmatpush1.bf16.msra.mxu1 %v1608_v24 }
 0x18c   :  { %724 = vmatprep.subr.bf16.mxu1 %v1614_v25 }
 0x18f   :  { %725 = vmatpush1.bf16.msra.mxu1 %v1619_v26 }
 0x190   :  { %726 = vmatprep.subr.bf16.mxu1 %v1364_v51 }
 0x193   :  { %727 = vmatpush1.bf16.msra.mxu1 %v1362_v53 }
 0x194   :  { %728 = vmatprep.subr.bf16.mxu1 %v1370_v55 }
 0x197   :  { %729 = vmatpush1.bf16.msra.mxu1 %v1368_v57 }
 0x251   :  { %v279_v60 = vpop.f32.mrb[4].mxu1 }
 0x252   :  { %v280_v61 = vadd.f32 %v1165_v59, %v279_v60  ;;  %v1295_v62 = vpop.f32.mrb[5].mxu1  ;;  %v1376_v60 = vld [vmem:[%s1725_s7 + $0xe4] ss:$16 sps:$4 sm:$0xff]  }
 0x253   :  { %v282_v63 = vpop.f32.mrb[6].mxu1  ;;  %v1379_v62 = vld [vmem:[%s1725_s7 + $0xec] ss:$16 sps:$4 sm:$0xff]   ;;  %730 = vmatprep.subr.bf16.mxu1 %v1376_v60 }
 0x254   :  { %v286_v0 = vmax.f32 %v280_v61, 0.0  ;;  %v283_v1 = vadd.f32 %v1165_v59, %v282_v63  ;;  %v1296_v2 = vpop.f32.mrb[7].mxu1  ;;  %v1374_v59 = vld [vmem:[%s1725_s7 + $0xe0] ss:$16 sps:$4 sm:$0xff]   ;;  %v1377_v61 = vld [vmem:[%s1725_s7 + $0xe8] ss:$16 sps:$4 sm:$0xff]  }
 0x255   :  { %731 = vmatpush1.bf16.msra.mxu1 %v1374_v59  ;;  %v1175_v63 = vld [vmem:[%s1726_s6] ss:$0 sm:$0xff] }
 0x256   :  { %288 = vst.msk [vmem:[#allocation5] sm:$0xff] %vm161_vm2, %v286_v0  ;;  %v287_v3 = vmax.f32 %v283_v1, 0.0  ;;  %1045 = vmatprep.subr.bf16.mxu1 %v1566_v17 }
 0x258   :  { %289 = vst.msk [vmem:[#allocation5 + $0x8] sm:$0xff] %vm161_vm2, %v287_v3 }
 0x25d   :  { %v293_v5 = vld [vmem:[#allocation5] ss:$2 sm:$0xf]  ;;  %v295_v6 = vld [vmem:[#allocation5 + $0x1] ss:$2 sm:$0xf] }
 0x25e   :  { %v296_v7 = vmax.f32 %v293_v5, %v295_v6 }
 0x25f   :  { %v299_v8 = vld [vmem:[#allocation5 + $0x8] ss:$2 sm:$0xf]  ;;  %v301_v9 = vld [vmem:[#allocation5 + $0x9] ss:$2 sm:$0xf] }
 0x260   :  { %v302_v10 = vmax.f32 %v299_v8, %v301_v9  ;;  %297 = vst.msk [vmem:[#allocation6 + $0x1] sm:$0xf] %vm291_vm7, %v296_v7  ;;  %v536_v9 = vlaneseq }
 0x262   :  { %303 = vst.msk [vmem:[#allocation6 + $0x7] sm:$0xf] %vm291_vm7, %v302_v10  ;;  %v537_v10 = vshrl.u32 %v536_v9, 7 }
 0x264   :  { %v538_v11 = vsub.s32 0, %v537_v10  ;;  %v546_v12 = vsub.s32 2, %v537_v10  ;;  %v550_v17 = vsub.s32 3, %v537_v10 }
 0x267   :  { %v305_v14 = vld [vmem:[#allocation6 + $0x1] sm:$0xf] }
 0x268   :  { %308 = vrot.lane.b32.xlu0 %v305_v14, %s1383_s26  ;;  %v304_v28 = vld [vmem:[#allocation6] sm:$0xf]  ;;  %v542_v14 = vsub.s32 1, %v537_v10 }
 0x269   :  { %v325_v15 = vld [vmem:[#allocation6 + $0x7] sm:$0xf]  ;;  %v306_v29 = vld [vmem:[#allocation6 + $0x2] sm:$0xf] }
 0x26a   :  { %328 = vrot.lane.b32.xlu1 %v325_v15, %s1383_s26  ;;  %v324_v33 = vld [vmem:[#allocation6 + $0x6] sm:$0xf]  ;;  %v1386_v15 = vmov 1983009808  }
 0x26b   :  { %v326_v34 = vld [vmem:[#allocation6 + $0x8] sm:$0xf] }
 0x2da   :  { %v309_v27 = vpop.permute.xlu0 %308 }
 0x2db   :  { %v311_v30 = vsel %vm161_vm2, %v304_v28, %v309_v27 }
 0x2dc   :  { %v1260_v31 = vpack.c.bf16 %v306_v29, %v311_v30  ;;  %v329_v32 = vpop.permute.xlu1 %328 }
 0x2dd   :  { %v331_v35 = vsel %vm161_vm2, %v324_v33, %v329_v32 }
 0x2de   :  { %323 = vst.msk [vmem:[#allocation7] sm:$0x33] %vm322_vm10, %v1260_v31  ;;  %v1261_v36 = vpack.c.bf16 %v326_v34, %v331_v35 }
 0x2e0   :  { %v339_v37 = vrot.slane %v1261_v36, 6 }
 0x2e2   :  { %344 = vst.msk [vmem:[#allocation7] sm:$0xcc] %vm343_vm13, %v339_v37 }
 0x2e9   :  { %v345_v38 = vld [vmem:[#allocation7] sm:$0xff] }
 0x2ea   :  { %v1176_v39 = vcombine.low %v345_v38, %v345_v38  ;;  %v1177_v40 = vcombine.high %v345_v38, %v345_v38 }
 0x2ec   :  { %1190 = vmatprep.mubr.msk.bf16.mxu0 %vm161_vm2, %v1177_v40 }
 0x2ed   :  { %491 = vmatmul.mubr.bf16.vlgmr.msra.gmra.mrb[0].mxu0 %v1176_v39 }
 0x2ee   :  { %758 = vmatpush1.bf16.msra.mxu0 %v1335_v41  ;;  %789 = vmatprep.mubr.bf16.mxu0 %v1385_v50 }
 0x2ef   :  { %759 = vmatprep.subr.bf16.mxu0 %v1343_v42 }
 0x2f2   :  { %760 = vmatpush1.bf16.msra.mxu0 %v1341_v43 }
 0x2f3   :  { %761 = vmatprep.subr.bf16.mxu0 %v1349_v44 }
 0x2f6   :  { %762 = vmatpush1.bf16.msra.mxu0 %v1347_v45 }
 0x2f7   :  { %763 = vmatprep.subr.bf16.mxu0 %v1355_v46 }
 0x2fa   :  { %764 = vmatpush1.bf16.msra.mxu0 %v1353_v47 }
 0x2fb   :  { %765 = vmatprep.subr.bf16.mxu0 %v1361_v48 }
 0x2fe   :  { %766 = vmatpush1.bf16.msra.mxu0 %v1359_v49 }
 0x2ff   :  { %767 = vmatprep.subr.bf16.mxu0 %v1367_v52 }
 0x302   :  { %768 = vmatpush1.bf16.msra.mxu0 %v1365_v54 }
 0x303   :  { %769 = vmatprep.subr.bf16.mxu0 %v1373_v56 }
 0x306   :  { %770 = vmatpush1.bf16.msra.mxu0 %v1371_v58 }
 0x307   :  { %771 = vmatprep.subr.bf16.mxu0 %v1379_v62 }
 0x30a   :  { %772 = vmatpush1.bf16.msra.mxu0 %v1377_v61 }
 0x30b   :  { %1086 = vmatprep.subr.bf16.mxu0 %v1571_v18  ;;  %v539_v18 = vrot.slane %v534_v13, %v538_v11 }
 0x3c0   :  { %v492_v0 = vpop.f32.mrb[0].mxu0 }
 0x3c1   :  { %v493_v1 = vadd.f32 %v1175_v63, %v492_v0  ;;  %v494_v2 = vpop.f32.mrb[1].mxu0 }
 0x3c2   :  { %v495_v3 = vpop.f32.mrb[2].mxu0 }
 0x3c3   :  { %v498_v4 = vmax.f32 %v493_v1, 0.0  ;;  %v496_v5 = vpop.f32.mrb[3].mxu0 }
 0x3c5   :  { %v499_v6 = vpack.c.bf16 %v498_v4, %v498_v4 }
 0x3c7   :  { %500 = vst [vmem:[#allocation8] sm:$0xf] %v499_v6 }
 0x3ce   :  { %v501_v7 = vld [vmem:[#allocation8] sm:$0x3] }
 0x3cf   :  { %749 = vmatmul.mubr.bf16.vlgmr.msra.gmra.mrb[8].mxu1 %v501_v7  ;;  %790 = vmatmul.mubr.bf16.vlgmr.msra.gmra.mrb[4].mxu0 %v501_v7 }
 0x3d0   :  { %1046 = vmatpush1.bf16.msra.mxu1 %v1561_v16  ;;  %1087 = vmatpush1.bf16.msra.mxu0 %v1335_v41  ;;  %v809_v16 = vunpack.c.l.s4 %v1386_v15  ;;  %v858_v41 = vld [vmem:[%s1727_s8] sm:$0xf] }
 0x3d1   :  { %1047 = vmatprep.subr.bf16.mxu1 %v1577_v19  ;;  %1088 = vmatprep.subr.bf16.mxu0 %v1343_v42  ;;  %v547_v19 = vrot.slane %v534_v13, %v546_v12  ;;  %v863_v42 = vrot.slane %v858_v41, %v538_v11 }
 0x3d2   :  { %1077 = vmatprep.mubr.bf16.mxu1 %v1385_v50  ;;  %1118 = vmatprep.mubr.bf16.mxu0 %v1385_v50  ;;  %v1380_v50 = vld [vmem:[#allocation8] ss:$0 sps:$4 sm:$0xcc]  }
 0x3d3   :  { %v883_v8 = vrot.slane %v1380_v50, 2 }
 0x3d4   :  { %1048 = vmatpush1.bf16.msra.mxu1 %v1584_v20  ;;  %1089 = vmatpush1.bf16.msra.mxu0 %v1341_v43  ;;  %v543_v20 = vrot.slane %v534_v13, %v542_v14  ;;  %v871_v43 = vrot.slane %v858_v41, %v546_v12 }
 0x3d5   :  { %1049 = vmatprep.subr.bf16.mxu1 %v1590_v21  ;;  %1090 = vmatprep.subr.bf16.mxu0 %v1349_v44  ;;  %v810_v21 = vunpack.c.0.s8 %v809_v16  ;;  %v867_v44 = vrot.slane %v858_v41, %v542_v14 }
 0x3d7   :  { %v813_v30 = vsub.s32 %v810_v21, %v537_v10 }
 0x3d8   :  { %1050 = vmatpush1.bf16.msra.mxu1 %v1596_v22  ;;  %1091 = vmatpush1.bf16.msra.mxu0 %v1347_v45  ;;  %v551_v22 = vrot.slane %v534_v13, %v550_v17  ;;  %v875_v45 = vrot.slane %v858_v41, %v550_v17 }
 0x3d9   :  { %1051 = vmatprep.subr.bf16.mxu1 %v1602_v23  ;;  %1092 = vmatprep.subr.bf16.mxu0 %v1355_v46 }
 0x3dc   :  { %1052 = vmatpush1.bf16.msra.mxu1 %v1608_v24  ;;  %1093 = vmatpush1.bf16.msra.mxu0 %v1353_v47 }
 0x3dd   :  { %1053 = vmatprep.subr.bf16.mxu1 %v1614_v25  ;;  %1094 = vmatprep.subr.bf16.mxu0 %v1361_v48 }
 0x3e0   :  { %1054 = vmatpush1.bf16.msra.mxu1 %v1619_v26  ;;  %1095 = vmatpush1.bf16.msra.mxu0 %v1359_v49 }
 0x3e1   :  { %1055 = vmatprep.subr.bf16.mxu1 %v1364_v51  ;;  %1096 = vmatprep.subr.bf16.mxu0 %v1367_v52 }
 0x3e4   :  { %1056 = vmatpush1.bf16.msra.mxu1 %v1362_v53  ;;  %1097 = vmatpush1.bf16.msra.mxu0 %v1365_v54 }
 0x3e5   :  { %1057 = vmatprep.subr.bf16.mxu1 %v1370_v55  ;;  %1098 = vmatprep.subr.bf16.mxu0 %v1373_v56 }
 0x3e8   :  { %1058 = vmatpush1.bf16.msra.mxu1 %v1368_v57  ;;  %1099 = vmatpush1.bf16.msra.mxu0 %v1371_v58 }
 0x3e9   :  { %1059 = vmatprep.subr.bf16.mxu1 %v1376_v60  ;;  %1100 = vmatprep.subr.bf16.mxu0 %v1379_v62 }
 0x3ec   :  { %1060 = vmatpush1.bf16.msra.mxu1 %v1374_v59  ;;  %1101 = vmatpush1.bf16.msra.mxu0 %v1377_v61 }
 0x3ef   :  { %1078 = vmatmul.mubr.bf16.vlgmr.msra.gmra.mrb[12].mxu1 %v883_v8  ;;  %1119 = vmatmul.mubr.bf16.vlgmr.msra.gmra.mrb[8].mxu0 %v883_v8 }
 0x4a2   :  { %v750_v23 = vpop.f32.mrb[8].mxu1  ;;  %v791_v24 = vpop.f32.mrb[4].mxu0 }
 0x4a3   :  { %v751_v25 = vadd.f32 %v750_v23, %v539_v18  ;;  %v792_v26 = vadd.f32 %v791_v24, %v547_v19  ;;  %v752_v27 = vpop.f32.mrb[9].mxu1  ;;  %v793_v28 = vpop.f32.mrb[5].mxu0 }
 0x4a4   :  { %v753_v29 = vadd.f32 %v752_v27, %v543_v20  ;;  %v794_v31 = vadd.f32 %v793_v28, %v551_v22  ;;  %v754_v32 = vpop.f32.mrb[10].mxu1  ;;  %v795_v33 = vpop.f32.mrb[6].mxu0 }
 0x4a5   :  { %v755_v34 = vpop.f32.mrb[11].mxu1  ;;  %v796_v35 = vpop.f32.mrb[7].mxu0 }
 0x4a6   :  { %v1223_v36 = vpack.c.bf16 %v753_v29, %v751_v25  ;;  %v1224_v37 = vpack.c.bf16 %v794_v31, %v792_v26 }
 0x4a8   :  { %v814_v38 = vrot.slane %v1223_v36, %v813_v30  ;;  %v821_v39 = vrot.slane %v1224_v37, %v813_v30 }
 0x4aa   :  { %v822_v40 = vcombine.low %v814_v38, %v821_v39 }
 0x4ac   :  { %824 = vst [vmem:[%s1728_s9] sm:$0xff] %v822_v40 }
 0x4c2   :  { %v1079_v46 = vpop.f32.mrb[12].mxu1  ;;  %v1120_v47 = vpop.f32.mrb[8].mxu0 }
 0x4c3   :  { %v1080_v48 = vadd.f32 %v1079_v46, %v863_v42  ;;  %v1121_v49 = vadd.f32 %v1120_v47, %v871_v43  ;;  %v1081_v51 = vpop.f32.mrb[13].mxu1  ;;  %v1122_v52 = vpop.f32.mrb[9].mxu0 }
 0x4c4   :  { %v1082_v53 = vadd.f32 %v1081_v51, %v867_v44  ;;  %v1123_v54 = vadd.f32 %v1122_v52, %v875_v45  ;;  %v1083_v55 = vpop.f32.mrb[14].mxu1  ;;  %v1124_v56 = vpop.f32.mrb[10].mxu0 }
 0x4c5   :  { %v1084_v57 = vpop.f32.mrb[15].mxu1  ;;  %v1125_v58 = vpop.f32.mrb[11].mxu0 }
 0x4c6   :  { %v1258_v59 = vpack.c.bf16 %v1082_v53, %v1080_v48  ;;  %v1259_v60 = vpack.c.bf16 %v1123_v54, %v1121_v49 }
 0x4c8   :  { %v1143_v61 = vrot.slane %v1258_v59, %v813_v30  ;;  %v1150_v62 = vrot.slane %v1259_v60, %v813_v30 }
 0x4ca   :  { %v1151_v63 = vcombine.low %v1143_v61, %v1150_v62 }
 0x4cc   :  { %1153 = vst [vmem:[%s1728_s9 + $0x8] sm:$0xff] %v1151_v63 }

</bundles_post_ra>
